<compile_context>
chip_gen: v6e
topology: v6e:2x2x1
jax: 0.10.0
libtpu: 0.0.40
codegen_flags: <defaults>
</compile_context>

<pallas_src>
import jax
import jax.numpy as jnp
from jax import lax
from jax.experimental import pallas as pl
from jax.experimental.pallas import tpu as pltpu


def _round_up(x, m):
    return (x + m - 1) // m * m


def _make_kernel(KH, KW, W, rows):
    """Fused conv(3x3,VALID) + BN-shift + ReLU on one flattened image.

    x_ref:     (H*W + KW-1, Cin)   bf16  flattened NHWC image + KW-1 zero rows
    w_ref:     (KH*KW, Cin, TC)    bf16  BN-scale-folded weights, lanes padded to 128
    shift_ref: (1, TC)             f32   folded BN shift
    o_ref:     (rows, OC)          bf16  rows = Ho*W (right-edge junk cols cropped in
                                          the wrapper), OC = real output channels <= TC
    """
    def kernel(x_ref, w_ref, shift_ref, o_ref):
        acc = None
        for kh in range(KH):
            for kw in range(KW):
                off = kh * W + kw                         # static flat tap offset
                z = x_ref[pl.ds(off, rows), :]            # (rows, Cin) shifted view
                d = jnp.dot(z, w_ref[kh * KW + kw],
                            preferred_element_type=jnp.float32)
                acc = d if acc is None else acc + d
        y = jnp.maximum(acc + shift_ref[...], 0.0)        # f32 epilogue (v5e-safe)
        oc = o_ref.shape[-1]
        o_ref[...] = y[:, :oc].astype(o_ref.dtype)        # lean store: real lanes only
    return kernel


def basic_conv(x_nchw, weight_oihw, gamma, beta, running_mean, running_var,
               eps=1e-5, *, compute_dtype=jnp.bfloat16):
    """BasicConv forward: conv(3x3, stride 1, pad 0, no bias) -> BN(eval) -> ReLU."""
    N, Cin, H, W = x_nchw.shape
    Cout, _, KH, KW = weight_oihw.shape
    Ho, Wo = H - KH + 1, W - KW + 1                       # stride=1, pad=0, dilation=1
    rows = Ho * W                                         # flat output rows per image
    hw_pad = H * W + (KW - 1)                             # zero rows so every tap fits

    # ---- fold eval-mode BatchNorm into per-output-channel scale / shift ----
    scale = (gamma / jnp.sqrt(running_var + eps)).astype(jnp.float32)
    shift = (beta - running_mean * scale).astype(jnp.float32)

    # ---- weights: OIHW -> HWIO -> (KH*KW, Cin, Cout_pad); fold scale; pad lanes ----
    cout_pad = _round_up(max(Cout, 128), 128)
    w = jnp.transpose(weight_oihw, (2, 3, 1, 0)).astype(jnp.float32) * scale
    w = w.reshape(KH * KW, Cin, Cout)
    w = jnp.pad(w, ((0, 0), (0, 0), (0, cout_pad - Cout))).astype(compute_dtype)
    shift_pad = jnp.pad(shift, (0, cout_pad - Cout)).reshape(1, cout_pad)

    # ---- output-channel tiling: keep MXU lanes padded, but write only real lanes ----
    if Cout % 128 != 0:
        tc = cout_pad                                     # single block, masked lean store
    else:
        tc = next(t for t in (512, 256, 128) if cout_pad % t == 0)
    ncb = cout_pad // tc
    oc = Cout // ncb                                      # real channels written per block

    # ---- flattened channel-last input: exactly one HBM read of the image ----
    x_flat = jnp.transpose(x_nchw, (0, 2, 3, 1)).astype(compute_dtype)
    x_flat = x_flat.reshape(N, H * W, Cin)
    x_flat = jnp.pad(x_flat, ((0, 0), (0, KW - 1), (0, 0)))

    itm = jnp.dtype(compute_dtype).itemsize
    cost = pl.CostEstimate(
        flops=int(2 * N * rows * KH * KW * Cin * cout_pad),
        transcendentals=0,
        bytes_accessed=int(x_flat.size * itm + w.size * itm
                           + shift_pad.size * 4 + N * rows * Cout * itm),
    )

    kernel = _make_kernel(KH, KW, W, rows)
    out_flat = pl.pallas_call(
        kernel,
        out_shape=jax.ShapeDtypeStruct((N, rows, Cout), compute_dtype),
        grid=(ncb, N),                                    # batch innermost: weights stay resident
        in_specs=[
            pl.BlockSpec((None, hw_pad, Cin), lambda c, n: (n, 0, 0)),   # one image / step
            pl.BlockSpec((KH * KW, Cin, tc), lambda c, n: (0, 0, c)),    # resident weights
            pl.BlockSpec((1, tc), lambda c, n: (0, c)),                  # resident BN shift
        ],
        out_specs=pl.BlockSpec((None, rows, oc), lambda c, n: (n, 0, c)),
        compiler_params=pltpu.CompilerParams(
            dimension_semantics=("parallel", "parallel"),  # shards across v7x's 2 TCs
            vmem_limit_bytes=48 * 1024 * 1024,             # fits v7x 64 MiB; ample on v5e/v6e
        ),
        cost_estimate=cost,
    )(x_flat, w, shift_pad)

    # crop junk right-edge columns, back to NCHW (runs in bf16, cast at the very end)
    out = out_flat.reshape(N, Ho, W, Cout)[:, :, :Wo, :]
    return jnp.transpose(out, (0, 3, 1, 2)).astype(x_nchw.dtype)


def _reference(x_nchw, weight_oihw, gamma, beta, running_mean, running_var,
               eps=1e-5):
    """Pure-JAX f32 reference of the same forward (eval-mode BN)."""
    y = lax.conv_general_dilated(
        x_nchw.astype(jnp.float32), weight_oihw.astype(jnp.float32),
        window_strides=(1, 1), padding="VALID",
        dimension_numbers=("NCHW", "OIHW", "NCHW"))
    scale = gamma / jnp.sqrt(running_var + eps)
    shift = beta - running_mean * scale
    y = y * scale[None, :, None, None] + shift[None, :, None, None]
    return jnp.maximum(y, 0.0)


if __name__ == "__main__":
    key = jax.random.PRNGKey(0)
    k_x, k_w, k_g, k_b, k_m, k_v = jax.random.split(key, 6)

    # Small shapes consistent with the module: in_planes=4, out_planes=8, 3x3 conv.
    N, Cin, H, W = 2, 4, 16, 16
    Cout, KH, KW = 8, 3, 3

    x = jax.random.normal(k_x, (N, Cin, H, W), dtype=jnp.float32)
    weight = jax.random.normal(k_w, (Cout, Cin, KH, KW), dtype=jnp.float32) * 0.1
    gamma = 1.0 + 0.1 * jax.random.normal(k_g, (Cout,), dtype=jnp.float32)
    beta = 0.1 * jax.random.normal(k_b, (Cout,), dtype=jnp.float32)
    running_mean = 0.1 * jax.random.normal(k_m, (Cout,), dtype=jnp.float32)
    running_var = jnp.abs(jax.random.normal(k_v, (Cout,), dtype=jnp.float32)) + 0.5

    out = basic_conv(x, weight, gamma, beta, running_mean, running_var)
    out = jax.block_until_ready(out)

    ref = _reference(x, weight, gamma, beta, running_mean, running_var)
    assert out.shape == (N, Cout, H - KH + 1, W - KW + 1)
    # bf16 inputs/weights/output store with f32 accumulation -> relaxed tolerance.
    assert jnp.allclose(out, ref, atol=5e-2, rtol=5e-2), float(jnp.max(jnp.abs(out - ref)))
    print("KERNEL_OK")
</pallas_src>

<mosaic_0001>
module attributes {stable_mosaic.version = 11 : i64} {
  func.func @kernel(%arg0: i32, %arg1: i32, %arg2: memref<1x258x4xbf16, #tpu.memory_space<vmem>>, %arg3: memref<9x4x128xbf16, #tpu.memory_space<vmem>>, %arg4: memref<1x128xf32, #tpu.memory_space<vmem>>, %arg5: memref<1x224x8xbf16, #tpu.memory_space<vmem>>) attributes {dimension_semantics = [#tpu.dimension_semantics<parallel>, #tpu.dimension_semantics<parallel>], iteration_bounds = array<i64: 1, 2>, scalar_prefetch = 0 : i64, scratch_operands = 0 : i64, tpu.core_type = #tpu.core_type<tc>, window_params = [{transform_indices = @transform_0, window_bounds = array<i64: 1, 258, 4>}, {transform_indices = @transform_1, window_bounds = array<i64: 9, 4, 128>}, {transform_indices = @transform_2, window_bounds = array<i64: 1, 128>}, {transform_indices = @transform_3, window_bounds = array<i64: 1, 224, 8>}]} {
    %c0 = arith.constant 0 : index
    %c0_0 = arith.constant 0 : index
    %c0_1 = arith.constant 0 : index
    %0 = vector.load %arg2[%c0, %c0_0, %c0_1] : memref<1x258x4xbf16, #tpu.memory_space<vmem>>, vector<1x224x4xbf16>
    %1 = vector.shape_cast %0 : vector<1x224x4xbf16> to vector<224x4xbf16>
    %c0_2 = arith.constant 0 : index
    %c0_3 = arith.constant 0 : index
    %c0_4 = arith.constant 0 : index
    %2 = vector.load %arg3[%c0_2, %c0_3, %c0_4] : memref<9x4x128xbf16, #tpu.memory_space<vmem>>, vector<1x4x128xbf16>
    %3 = vector.shape_cast %2 : vector<1x4x128xbf16> to vector<4x128xbf16>
    %cst = arith.constant dense<0.000000e+00> : vector<224x128xf32>
    %4 = tpu.matmul %1, %3, %cst {dimension_numbers = #tpu.dot_dimension_numbers<[1], [0], [0], [1], [0, 0, 1, 1], [], []>} : vector<224x4xbf16>, vector<4x128xbf16>, vector<224x128xf32> -> vector<224x128xf32>
    %c0_5 = arith.constant 0 : index
    %c1 = arith.constant 1 : index
    %c0_6 = arith.constant 0 : index
    %5 = vector.load %arg2[%c0_5, %c1, %c0_6] : memref<1x258x4xbf16, #tpu.memory_space<vmem>>, vector<1x224x4xbf16>
    %6 = vector.shape_cast %5 : vector<1x224x4xbf16> to vector<224x4xbf16>
    %c1_7 = arith.constant 1 : index
    %c0_8 = arith.constant 0 : index
    %c0_9 = arith.constant 0 : index
    %7 = vector.load %arg3[%c1_7, %c0_8, %c0_9] : memref<9x4x128xbf16, #tpu.memory_space<vmem>>, vector<1x4x128xbf16>
    %8 = vector.shape_cast %7 : vector<1x4x128xbf16> to vector<4x128xbf16>
    %cst_10 = arith.constant dense<0.000000e+00> : vector<224x128xf32>
    %9 = tpu.matmul %6, %8, %cst_10 {dimension_numbers = #tpu.dot_dimension_numbers<[1], [0], [0], [1], [0, 0, 1, 1], [], []>} : vector<224x4xbf16>, vector<4x128xbf16>, vector<224x128xf32> -> vector<224x128xf32>
    %10 = arith.addf %4, %9 : vector<224x128xf32>
    %c0_11 = arith.constant 0 : index
    %c2 = arith.constant 2 : index
    %c0_12 = arith.constant 0 : index
    %11 = vector.load %arg2[%c0_11, %c2, %c0_12] : memref<1x258x4xbf16, #tpu.memory_space<vmem>>, vector<1x224x4xbf16>
    %12 = vector.shape_cast %11 : vector<1x224x4xbf16> to vector<224x4xbf16>
    %c2_13 = arith.constant 2 : index
    %c0_14 = arith.constant 0 : index
    %c0_15 = arith.constant 0 : index
    %13 = vector.load %arg3[%c2_13, %c0_14, %c0_15] : memref<9x4x128xbf16, #tpu.memory_space<vmem>>, vector<1x4x128xbf16>
    %14 = vector.shape_cast %13 : vector<1x4x128xbf16> to vector<4x128xbf16>
    %cst_16 = arith.constant dense<0.000000e+00> : vector<224x128xf32>
    %15 = tpu.matmul %12, %14, %cst_16 {dimension_numbers = #tpu.dot_dimension_numbers<[1], [0], [0], [1], [0, 0, 1, 1], [], []>} : vector<224x4xbf16>, vector<4x128xbf16>, vector<224x128xf32> -> vector<224x128xf32>
    %16 = arith.addf %10, %15 : vector<224x128xf32>
    %c0_17 = arith.constant 0 : index
    %c16 = arith.constant 16 : index
    %c0_18 = arith.constant 0 : index
    %17 = vector.load %arg2[%c0_17, %c16, %c0_18] : memref<1x258x4xbf16, #tpu.memory_space<vmem>>, vector<1x224x4xbf16>
    %18 = vector.shape_cast %17 : vector<1x224x4xbf16> to vector<224x4xbf16>
    %c3 = arith.constant 3 : index
    %c0_19 = arith.constant 0 : index
    %c0_20 = arith.constant 0 : index
    %19 = vector.load %arg3[%c3, %c0_19, %c0_20] : memref<9x4x128xbf16, #tpu.memory_space<vmem>>, vector<1x4x128xbf16>
    %20 = vector.shape_cast %19 : vector<1x4x128xbf16> to vector<4x128xbf16>
    %cst_21 = arith.constant dense<0.000000e+00> : vector<224x128xf32>
    %21 = tpu.matmul %18, %20, %cst_21 {dimension_numbers = #tpu.dot_dimension_numbers<[1], [0], [0], [1], [0, 0, 1, 1], [], []>} : vector<224x4xbf16>, vector<4x128xbf16>, vector<224x128xf32> -> vector<224x128xf32>
    %22 = arith.addf %16, %21 : vector<224x128xf32>
    %c0_22 = arith.constant 0 : index
    %c17 = arith.constant 17 : index
    %c0_23 = arith.constant 0 : index
    %23 = vector.load %arg2[%c0_22, %c17, %c0_23] : memref<1x258x4xbf16, #tpu.memory_space<vmem>>, vector<1x224x4xbf16>
    %24 = vector.shape_cast %23 : vector<1x224x4xbf16> to vector<224x4xbf16>
    %c4 = arith.constant 4 : index
    %c0_24 = arith.constant 0 : index
    %c0_25 = arith.constant 0 : index
    %25 = vector.load %arg3[%c4, %c0_24, %c0_25] : memref<9x4x128xbf16, #tpu.memory_space<vmem>>, vector<1x4x128xbf16>
    %26 = vector.shape_cast %25 : vector<1x4x128xbf16> to vector<4x128xbf16>
    %cst_26 = arith.constant dense<0.000000e+00> : vector<224x128xf32>
    %27 = tpu.matmul %24, %26, %cst_26 {dimension_numbers = #tpu.dot_dimension_numbers<[1], [0], [0], [1], [0, 0, 1, 1], [], []>} : vector<224x4xbf16>, vector<4x128xbf16>, vector<224x128xf32> -> vector<224x128xf32>
    %28 = arith.addf %22, %27 : vector<224x128xf32>
    %c0_27 = arith.constant 0 : index
    %c18 = arith.constant 18 : index
    %c0_28 = arith.constant 0 : index
    %29 = vector.load %arg2[%c0_27, %c18, %c0_28] : memref<1x258x4xbf16, #tpu.memory_space<vmem>>, vector<1x224x4xbf16>
    %30 = vector.shape_cast %29 : vector<1x224x4xbf16> to vector<224x4xbf16>
    %c5 = arith.constant 5 : index
    %c0_29 = arith.constant 0 : index
    %c0_30 = arith.constant 0 : index
    %31 = vector.load %arg3[%c5, %c0_29, %c0_30] : memref<9x4x128xbf16, #tpu.memory_space<vmem>>, vector<1x4x128xbf16>
    %32 = vector.shape_cast %31 : vector<1x4x128xbf16> to vector<4x128xbf16>
    %cst_31 = arith.constant dense<0.000000e+00> : vector<224x128xf32>
    %33 = tpu.matmul %30, %32, %cst_31 {dimension_numbers = #tpu.dot_dimension_numbers<[1], [0], [0], [1], [0, 0, 1, 1], [], []>} : vector<224x4xbf16>, vector<4x128xbf16>, vector<224x128xf32> -> vector<224x128xf32>
    %34 = arith.addf %28, %33 : vector<224x128xf32>
    %c0_32 = arith.constant 0 : index
    %c32 = arith.constant 32 : index
    %c0_33 = arith.constant 0 : index
    %35 = vector.load %arg2[%c0_32, %c32, %c0_33] : memref<1x258x4xbf16, #tpu.memory_space<vmem>>, vector<1x224x4xbf16>
    %36 = vector.shape_cast %35 : vector<1x224x4xbf16> to vector<224x4xbf16>
    %c6 = arith.constant 6 : index
    %c0_34 = arith.constant 0 : index
    %c0_35 = arith.constant 0 : index
    %37 = vector.load %arg3[%c6, %c0_34, %c0_35] : memref<9x4x128xbf16, #tpu.memory_space<vmem>>, vector<1x4x128xbf16>
    %38 = vector.shape_cast %37 : vector<1x4x128xbf16> to vector<4x128xbf16>
    %cst_36 = arith.constant dense<0.000000e+00> : vector<224x128xf32>
    %39 = tpu.matmul %36, %38, %cst_36 {dimension_numbers = #tpu.dot_dimension_numbers<[1], [0], [0], [1], [0, 0, 1, 1], [], []>} : vector<224x4xbf16>, vector<4x128xbf16>, vector<224x128xf32> -> vector<224x128xf32>
    %40 = arith.addf %34, %39 : vector<224x128xf32>
    %c0_37 = arith.constant 0 : index
    %c33 = arith.constant 33 : index
    %c0_38 = arith.constant 0 : index
    %41 = vector.load %arg2[%c0_37, %c33, %c0_38] : memref<1x258x4xbf16, #tpu.memory_space<vmem>>, vector<1x224x4xbf16>
    %42 = vector.shape_cast %41 : vector<1x224x4xbf16> to vector<224x4xbf16>
    %c7 = arith.constant 7 : index
    %c0_39 = arith.constant 0 : index
    %c0_40 = arith.constant 0 : index
    %43 = vector.load %arg3[%c7, %c0_39, %c0_40] : memref<9x4x128xbf16, #tpu.memory_space<vmem>>, vector<1x4x128xbf16>
    %44 = vector.shape_cast %43 : vector<1x4x128xbf16> to vector<4x128xbf16>
    %cst_41 = arith.constant dense<0.000000e+00> : vector<224x128xf32>
    %45 = tpu.matmul %42, %44, %cst_41 {dimension_numbers = #tpu.dot_dimension_numbers<[1], [0], [0], [1], [0, 0, 1, 1], [], []>} : vector<224x4xbf16>, vector<4x128xbf16>, vector<224x128xf32> -> vector<224x128xf32>
    %46 = arith.addf %40, %45 : vector<224x128xf32>
    %c0_42 = arith.constant 0 : index
    %c34 = arith.constant 34 : index
    %c0_43 = arith.constant 0 : index
    %47 = vector.load %arg2[%c0_42, %c34, %c0_43] : memref<1x258x4xbf16, #tpu.memory_space<vmem>>, vector<1x224x4xbf16>
    %48 = vector.shape_cast %47 : vector<1x224x4xbf16> to vector<224x4xbf16>
    %c8 = arith.constant 8 : index
    %c0_44 = arith.constant 0 : index
    %c0_45 = arith.constant 0 : index
    %49 = vector.load %arg3[%c8, %c0_44, %c0_45] : memref<9x4x128xbf16, #tpu.memory_space<vmem>>, vector<1x4x128xbf16>
    %50 = vector.shape_cast %49 : vector<1x4x128xbf16> to vector<4x128xbf16>
    %cst_46 = arith.constant dense<0.000000e+00> : vector<224x128xf32>
    %51 = tpu.matmul %48, %50, %cst_46 {dimension_numbers = #tpu.dot_dimension_numbers<[1], [0], [0], [1], [0, 0, 1, 1], [], []>} : vector<224x4xbf16>, vector<4x128xbf16>, vector<224x128xf32> -> vector<224x128xf32>
    %52 = arith.addf %46, %51 : vector<224x128xf32>
    %c0_47 = arith.constant 0 : index
    %c0_48 = arith.constant 0 : index
    %53 = vector.load %arg4[%c0_47, %c0_48] : memref<1x128xf32, #tpu.memory_space<vmem>>, vector<1x128xf32>
    %54 = vector.broadcast %53 : vector<1x128xf32> to vector<224x128xf32>
    %55 = arith.addf %52, %54 : vector<224x128xf32>
    %cst_49 = arith.constant 0.000000e+00 : f32
    %56 = vector.broadcast %cst_49 : f32 to vector<224x128xf32>
    %57 = arith.maximumf %55, %56 : vector<224x128xf32>
    %58 = vector.extract_strided_slice %57 {offsets = [0, 0], sizes = [224, 8], strides = [1, 1]} : vector<224x128xf32> to vector<224x8xf32>
    %59 = arith.truncf %58 : vector<224x8xf32> to vector<224x8xbf16>
    %c0_50 = arith.constant 0 : index
    %c0_51 = arith.constant 0 : index
    %c0_52 = arith.constant 0 : index
    %60 = vector.load %arg5[%c0_50, %c0_51, %c0_52] : memref<1x224x8xbf16, #tpu.memory_space<vmem>>, vector<1x224x8xbf16>
    %61 = vector.shape_cast %60 : vector<1x224x8xbf16> to vector<224x8xbf16>
    %62 = vector.shape_cast %59 : vector<224x8xbf16> to vector<1x224x8xbf16>
    tpu.vector_store %arg5[%c0_50, %c0_51, %c0_52], %62 {strides = array<i32>} : memref<1x224x8xbf16, #tpu.memory_space<vmem>>, vector<1x224x8xbf16>,
    return
  }
  func.func @transform_0(%arg0: i32, %arg1: i32) -> (i32, i32, i32) {
    %c0_i32 = arith.constant 0 : i32
    %c0_i32_0 = arith.constant 0 : i32
    %c0_i32_1 = arith.constant 0 : i32
    return %arg1, %c0_i32, %c0_i32_0 : i32, i32, i32
  }
  func.func @transform_1(%arg0: i32, %arg1: i32) -> (i32, i32, i32) {
    %c0_i32 = arith.constant 0 : i32
    %c0_i32_0 = arith.constant 0 : i32
    %c0_i32_1 = arith.constant 0 : i32
    return %c0_i32, %c0_i32_0, %arg0 : i32, i32, i32
  }
  func.func @transform_2(%arg0: i32, %arg1: i32) -> (i32, i32) {
    %c0_i32 = arith.constant 0 : i32
    %c0_i32_0 = arith.constant 0 : i32
    return %c0_i32, %arg0 : i32, i32
  }
  func.func @transform_3(%arg0: i32, %arg1: i32) -> (i32, i32, i32) {
    %c0_i32 = arith.constant 0 : i32
    %c0_i32_0 = arith.constant 0 : i32
    return %arg1, %c0_i32, %arg0 : i32, i32, i32
  }
}

</mosaic_0001>

<bundles_post_ra>
// kernel: tpu_custom_call.1
= control target key start
LH: loop header
LB: loop body
LE: loop exit
PB: predicated region body
PF: predicated region fallthrough
CT: control target
= control target key end

     0   :  { %s4235_s12 = smov 0   ;;  %s4237_s13 = smov 0   ;;  %s5354_s0 = inlined_call_operand.vmem [shape: bf16[2,258,4], index: 0, kind: input, shape index: {}]   ;;  %s5355_s1 = inlined_call_operand.vmem [shape: bf16[9,4,128], index: 1, kind: input, shape index: {}]   ;;  %s5356_s2 = inlined_call_operand.vmem [shape: f32[1,128], index: 2, kind: input, shape index: {}]   ;;  %s5357_s3 = inlined_call_operand.vmem [shape: bf16[2,224,8], index: 3, kind: output, shape index: {}]  }
   0x1   :  { %s4239_s14 = smov 0  }
   0x2 LB: > { %s22_s15 = sadd.s32 1, %s4209_s13  ;;  %p3400_p0 = scmp.ge.s32.totalorder %s4213_s14, 1  ;;  %s4213_s14 = sphi %s4239_s14, %s13_s14   ;;  %s4209_s13 = sphi %s4237_s13, %s5425_s13   ;;  %s4205_s12 = sphi %s4235_s12, %s5424_s12  }
   0x3   : > { %p23_p1 = scmp.ge.s32.totalorder %s22_s15, 2  ;;  %p168_p2 = scmp.lt.s32.totalorder %s4213_s14, 3 }
   0x5   : > { %s5427_s15 = smov (%p23_p1, %s22_s15), 0  ;;  %p169_p3 = pnand %p3400_p0, %p168_p2 }
   0x7   : > { %172 = sbr.rel (%p169_p3) target bundleno = 485 (0x1e5), region = 32 }
   0xc   : > { %v3403_v0 = vld [vmem:[%s5355_s1 + $0x2] sm:$0x3]  ;;  %vm488_vm0 = vcmask 1041408   ;;  %p202_p4 = scmp.lt.s32.totalorder %s4205_s12, 1  ;;  %v3447_v2 = vld [vmem:[%s5355_s1 + $0x4] sm:$0x3] }
   0xd   : > { %4079 = vmatprep.subr.msk.bf16.mxu0 %vm488_vm0, %v3403_v0  ;;  %4080 = vmatprep.subr.msk.bf16.mxu1 %vm488_vm0, %v3403_v0  ;;  %v490_v1 = vsel %vm488_vm0, %v3403_v0, 0  ;;  %v251_v3 = vld [vmem:[%s5355_s1] sm:$0x3]  ;;  %vm328_vm1 = vsmask.f32 7424  ;;  %vm445_vm2 = vcmask 31744  }
   0xe   : > { %3808 = vmatpush3.bf16.msra.mxu0 %v490_v1  ;;  %4078 = vmatpush3.bf16.msra.mxu1 %v490_v1  ;;  %s5429_s12 = smov (!%p202_p4, %s4205_s12), 1  ;;  %v892_v8 = vsel %vm488_vm0, %v3447_v2, 0  ;;  %v666_v16 = vsel %vm488_vm0, %v251_v3, 0  ;;  %v4318_v33 = vld [vmem:[%s5355_s1 + $0x8] sm:$0x3]  ;;  %vm819_vm3 = vcmask 1046528  }
   0xf   : > { %4082 = vmatprep.subr.msk.bf16.mxu0 %vm488_vm0, %v3447_v2  ;;  %4081 = vmatprep.subr.msk.bf16.mxu1 %vm488_vm0, %v251_v3  ;;  %s4089_s22 = smul.u32 132, %s5429_s12  ;;  %v4338_v45 = vld [vmem:[%s5355_s1 + $0x6] sm:$0x3]  ;;  %vm3260_vm4 = vcmask 60416  }
  0x10   : > { %s4090_s17 = smul.u32 112, %s5429_s12 }
  0x11   : > { %s4273_s25 = scalar_lea.vmem %s5354_s0, %s4089_s22 }
  0x12   : > { %v223_v4 = vld [vmem:[%s4273_s25] sm:$0xf]  ;;  %v4277_v5 = vld [vmem:[%s4273_s25 + $0x4] sm:$0xf]  ;;  %v4283_v7 = vld [vmem:[%s4273_s25 + $0x8] sm:$0xff]   ;;  %s5197_s19 = scalar_lea.vmem %s5357_s3, %s4090_s17 }
  0x13   : > { %v4280_v6 = vcombine.low %v223_v4, %v4277_v5  ;;  %v337_v11 = vshll.u32 %v4283_v7, 16  ;;  %v341_v12 = vshrl.u32 %v4283_v7, 16  ;;  %v4291_v13 = vld [vmem:[%s4273_s25 + $0x40] sm:$0xff]   ;;  %v4294_v14 = vld [vmem:[%s4273_s25 + $0x48] sm:$0xff]   ;;  %v4297_v15 = vld [vmem:[%s4273_s25 + $0x10] sm:$0xff]  }
  0x14   : > { %v393_v19 = vshll.u32 %v4291_v13, 16  ;;  %v397_v20 = vshrl.u32 %v4291_v13, 16  ;;  %v401_v21 = vshll.u32 %v4294_v14, 16  ;;  %v405_v22 = vshrl.u32 %v4294_v14, 16  ;;  %v4306_v24 = vld [vmem:[%s4273_s25 + $0x50] sm:$0xff]   ;;  %v4311_v28 = vld [vmem:[%s4273_s25 + $0x18] sm:$0xff]  }
  0x15   : > { %v330_v9 = vshrl.u32 %v4280_v6, 16  ;;  %v332_v10 = vshll.u32 %v4280_v6, 16  ;;  %v339_v18 = vrot.slane %v337_v11, 1  ;;  %v345_v23 = vshll.u32 %v4297_v15, 16  ;;  %v4324_v37 = vld [vmem:[%s4273_s25 + $0x58] sm:$0xff]   ;;  %v4328_v39 = vld [vmem:[%s4273_s25 + $0x20] sm:$0xff]  }
  0x16   : > { %v4308_v27 = vrot.slane %v393_v19, 1  ;;  %v403_v29 = vrot.slane %v401_v21, 1  ;;  %v409_v31 = vshll.u32 %v4306_v24, 16  ;;  %v349_v32 = vshrl.u32 %v4297_v15, 16  ;;  %v4333_v44 = vld [vmem:[%s4273_s25 + $0x60] sm:$0xff]   ;;  %v4345_v50 = vld [vmem:[%s4273_s25 + $0x28] sm:$0xff]  }
  0x17   : > { %v334_v17 = vrot.slane %v332_v10, 1  ;;  %v343_v26 = vor.u32 %v341_v12, %v339_v18  ;;  %v347_v30 = vrot.slane %v345_v23, 1  ;;  %v353_v36 = vshll.u32 %v4311_v28, 16  ;;  %v4360_v62 = vld [vmem:[%s4273_s25 + $0x68] sm:$0xff]   ;;  %v4370_v10 = vld [vmem:[%s4273_s25 + $0x30] sm:$0xff]   ;;  %v4373_v11 = vld [vmem:[%s4273_s25 + $0x38] sm:$0xff]  }
  0x18   : > { %v399_v35 = vor.u32 %v397_v20, %v4308_v27  ;;  %v413_v38 = vshrl.u32 %v4306_v24, 16  ;;  %v407_v40 = vor.u32 %v405_v22, %v403_v29  ;;  %v411_v42 = vrot.slane %v409_v31, 1 }
  0x19   : > { %v335_v25 = vor.u32 %v334_v17, %v330_v9  ;;  %v348_v41 = vsel %vm328_vm1, %v343_v26, %v347_v30  ;;  %v351_v43 = vor.u32 %v349_v32, %v347_v30  ;;  %v355_v47 = vrot.slane %v353_v36, 1  ;;  %v4377_v17 = vld [vmem:[%s4273_s25 + $0x70] ss:$0 sps:$4 sm:$0x11]  }
  0x1a   : > { %v404_v46 = vsel %vm328_vm1, %v399_v35, %v403_v29  ;;  %v417_v48 = vshll.u32 %v4324_v37, 16  ;;  %v357_v49 = vshrl.u32 %v4311_v28, 16  ;;  %v412_v51 = vsel %vm328_vm1, %v407_v40, %v411_v42 }
  0x1b   : > { %v340_v34 = vsel %vm328_vm1, %v335_v25, %v339_v18  ;;  %3825 = vmatprep.mubr.msk.bf16.mxu1 %vm445_vm2, %v404_v46  ;;  %v415_v52 = vor.u32 %v413_v38, %v411_v42  ;;  %v361_v53 = vshll.u32 %v4328_v39, 16  ;;  %v421_v54 = vshrl.u32 %v4324_v37, 16 }
  0x1c   : > { %3809 = vmatprep.mubr.msk.bf16.mxu0 %vm445_vm2, %v340_v34  ;;  %3826 = vmatmul.mubr.msk.bf16.vlgmr.msra.gmra.mxu1 %vm445_vm2, %v412_v51  ;;  %v356_v55 = vsel %vm328_vm1, %v351_v43, %v355_v47  ;;  %v419_v56 = vrot.slane %v417_v48, 1  ;;  %v359_v57 = vor.u32 %v357_v49, %v355_v47  ;;  %v425_v58 = vshll.u32 %v4333_v44, 16  ;;  %v813_v34 = vld [vmem:[%s4273_s25] sm:$0xe] }
  0x1d   : > { %3810 = vmatmul.mubr.msk.bf16.vlgmr.msra.gmra.mxu0 %vm445_vm2, %v348_v41  ;;  %3838 = vmatpush3.bf16.msra.mxu1 %v666_v16  ;;  %v363_v59 = vrot.slane %v361_v53, 1  ;;  %v365_v60 = vshrl.u32 %v4328_v39, 16  ;;  %v369_v61 = vshll.u32 %v4345_v50, 16  ;;  %v429_v2 = vshrl.u32 %v4333_v44, 16 }
  0x1e   : > { %3868 = vmatpush3.bf16.msra.mxu0 %v892_v8  ;;  %3813 = vmatprep.mubr.msk.bf16.mxu0 %vm445_vm2, %v356_v55  ;;  %v420_v63 = vsel %vm328_vm1, %v415_v52, %v419_v56  ;;  %v423_v0 = vor.u32 %v421_v54, %v419_v56  ;;  %v427_v1 = vrot.slane %v425_v58, 1  ;;  %v433_v9 = vshll.u32 %v4360_v62, 16  ;;  %v4413_v54 = vld [vmem:[%s5355_s1 + $0xa] sm:$0x3] }
  0x1f   : > { %4084 = vmatprep.subr.msk.bf16.mxu0 %vm488_vm0, %v4318_v33  ;;  %4083 = vmatprep.subr.msk.bf16.mxu1 %vm488_vm0, %v4338_v45  ;;  %v364_v3 = vsel %vm328_vm1, %v359_v57, %v363_v59  ;;  %v367_v4 = vor.u32 %v365_v60, %v363_v59  ;;  %v371_v8 = vrot.slane %v369_v61, 1  ;;  %v373_v16 = vshrl.u32 %v4345_v50, 16 }
  0x20   : > { %3829 = vmatprep.mubr.msk.bf16.mxu1 %vm445_vm2, %v420_v63  ;;  %v431_v12 = vor.u32 %v429_v2, %v427_v1  ;;  %v437_v18 = vshrl.u32 %v4360_v62, 16  ;;  %v428_v19 = vsel %vm328_vm1, %v423_v0, %v427_v1  ;;  %v435_v21 = vrot.slane %v433_v9, 1  ;;  %v1385_v1 = vld [vmem:[%s4273_s25 + $0x8] sm:$0xf] }
  0x21   : > { %v372_v20 = vsel %vm328_vm1, %v367_v4, %v371_v8  ;;  %v377_v22 = vshll.u32 %v4370_v10, 16  ;;  %v441_v23 = vshll.u32 %v4377_v17, 16  ;;  %v381_v25 = vshrl.u32 %v4370_v10, 16 }
  0x22   : > { %v385_v26 = vshll.u32 %v4373_v11, 16  ;;  %v436_v29 = vsel %vm328_vm1, %v431_v12, %v435_v21  ;;  %v375_v30 = vor.u32 %v373_v16, %v371_v8  ;;  %v439_v35 = vor.u32 %v437_v18, %v435_v21  ;;  %v4496_v21 = vld [vmem:[%s4273_s25 + $0x18] sm:$0xff]  }
  0x23   : > { %v379_v31 = vrot.slane %v377_v22, 1  ;;  %v443_v36 = vrot.slane %v441_v23, 1  ;;  %v389_v41 = vshrl.u32 %v4373_v11, 16  ;;  %v3448_v43 = vcombine.low %v813_v34, %v4277_v5  ;;  %v4503_v23 = vld [vmem:[%s4273_s25 + $0x20] sm:$0xff]  }
  0x24   : > { %3830 = vmatmul.mubr.msk.bf16.gmra.mxu1 %vm445_vm2, %v428_v19  ;;  %v387_v32 = vrot.slane %v385_v26, 1  ;;  %v821_v49 = vrot.slane %v4283_v7, 1  ;;  %v1210_v52 = vsel %vm488_vm0, %v4338_v45, 0  ;;  %v823_v53 = vrot.slane %v4297_v15, 1 }
  0x25   : > { %3814 = vmatmul.mubr.msk.bf16.gmra.mxu0 %vm445_vm2, %v364_v3  ;;  %3833 = vmatprep.mubr.msk.bf16.mxu1 %vm445_vm2, %v436_v29  ;;  %v383_v38 = vor.u32 %v381_v25, %v379_v31  ;;  %v380_v40 = vsel %vm328_vm1, %v375_v30, %v379_v31  ;;  %v444_v46 = vsel %vm328_vm1, %v439_v35, %v443_v36  ;;  %v820_v48 = vrot.slane %v3448_v43, 1  ;;  %v4472_v3 = vld [vmem:[%s4273_s25 + $0xc] sm:$0xf]  ;;  %v4132_v30 = vld [vmem:[%s4273_s25 + $0x10] sm:$0xff]  }
  0x26   : > { %3817 = vmatprep.mubr.msk.bf16.mxu0 %vm445_vm2, %v372_v20  ;;  %v391_v47 = vor.u32 %v389_v41, %v387_v32  ;;  %v1648_v45 = vsel %vm488_vm0, %v4318_v33, 0  ;;  %v829_v56 = vrot.slane %v4345_v50, 1  ;;  %v831_v58 = vrot.slane %v4370_v10, 1  ;;  %v4131_v20 = vld [vmem:[%s4273_s25 + $0x8] sm:$0xff]   ;;  %v4528_v43 = vld [vmem:[%s4273_s25 + $0x30] sm:$0xff]  }
  0x27   : > { %v388_v42 = vsel %vm328_vm1, %v383_v38, %v387_v32  ;;  %v822_v5 = vsel %vm819_vm3, %v820_v48, %v821_v49  ;;  %v835_v60 = vrot.slane %v4291_v13, 1  ;;  %v839_v0 = vrot.slane %v4306_v24, 1  ;;  %v4133_v32 = vld [vmem:[%s4273_s25 + $0x18] sm:$0xff]   ;;  %v4518_v36 = vld [vmem:[%s4273_s25 + $0x28] sm:$0xff]  }
  0x28   : > { %v396_v51 = vsel %vm328_vm1, %v391_v47, %v4308_v27  ;;  %v824_v27 = vsel %vm819_vm3, %v821_v49, %v823_v53  ;;  %v841_v2 = vrot.slane %v4324_v37, 1  ;;  %v3493_v4 = vcombine.low %v1385_v1, %v4472_v3  ;;  %v4136_v49 = vld [vmem:[%s4273_s25 + $0x20] sm:$0xff]  }
  0x29   : > { %v845_v9 = vrot.slane %v4360_v62, 1  ;;  %v1505_v25 = vshll.u32 %v4496_v21, 16  ;;  %v1509_v31 = vshrl.u32 %v4496_v21, 16  ;;  %v1901_v34 = vsel %vm488_vm0, %v4413_v54, 0 }
  0x2a   : > { %v842_v8 = vsel %vm819_vm3, %v839_v0, %v841_v2  ;;  %v1490_v12 = vshrl.u32 %v3493_v4, 16  ;;  %v1517_v48 = vshrl.u32 %v4503_v23, 16 }
  0x2b   : > { %v1507_v35 = vrot.slane %v1505_v25, 1 }
  0x2c   : > { %3834 = vmatmul.mubr.msk.bf16.gmra.mxu1 %vm445_vm2, %v444_v46  ;;  %v1521_v46 = vshll.u32 %v4518_v36, 16 }
  0x2d   : > { %3818 = vmatmul.mubr.msk.bf16.gmra.mxu0 %vm445_vm2, %v380_v40  ;;  %3839 = vmatprep.mubr.msk.bf16.mxu1 %vm445_vm2, %v4280_v6  ;;  %v825_v6 = vrot.slane %v4311_v28, 1  ;;  %v4524_v40 = vld [vmem:[%s5355_s1 + $0xe] sm:$0x3]  ;;  %v1511_v41 = vor.u32 %v1509_v31, %v1507_v35 }
  0x2e   : > { %3821 = vmatprep.mubr.msk.bf16.mxu0 %vm445_vm2, %v388_v42 }
  0x2f   : > { %v826_v55 = vsel %vm819_vm3, %v823_v53, %v825_v6  ;;  %v1529_v53 = vshll.u32 %v4528_v43, 16 }
  0x34   : > { %3840 = vmatmul.mubr.msk.bf16.vlgmr.msra.gmra.mxu1 %vm445_vm2, %v4283_v7  ;;  %v4430_v7 = vld [vmem:[%s5355_s1 + $0xc] sm:$0x3] }
  0x35   : > { %3822 = vmatmul.mubr.msk.bf16.gmra.mxu0 %vm445_vm2, %v396_v51  ;;  %3898 = vmatpush3.bf16.msra.mxu1 %v1210_v52  ;;  %v2219_v51 = vsel %vm488_vm0, %v4430_v7, 0  ;;  %v1525_v52 = vshrl.u32 %v4518_v36, 16 }
  0x36   : > { %3869 = vmatprep.mubr.msk.bf16.mxu0 %vm445_vm2, %v822_v5  ;;  %3843 = vmatprep.mubr.msk.bf16.mxu1 %vm445_vm2, %v4297_v15  ;;  %v827_v15 = vrot.slane %v4328_v39, 1 }
  0x37   : > { %4085 = vmatprep.subr.msk.bf16.mxu1 %vm488_vm0, %v4413_v54  ;;  %v4138_v54 = vld [vmem:[%s4273_s25 + $0x28] sm:$0xff]  }
  0x38   : > { %v828_v33 = vsel %vm819_vm3, %v825_v6, %v827_v15  ;;  %v830_v57 = vsel %vm819_vm3, %v827_v15, %v829_v56  ;;  %v4546_v6 = vld [vmem:[%s5355_s1 + $0x10] sm:$0x3]  ;;  %v1531_v15 = vrot.slane %v1529_v53, 1 }
  0x3c   : > { %3844 = vmatmul.mubr.msk.bf16.gmra.mxu1 %vm445_vm2, %v4311_v28  ;;  %v833_v28 = vrot.slane %v4373_v11, 1 }
  0x3d   : > { %3870 = vmatmul.mubr.msk.bf16.vlgmr.msra.gmra.mxu0 %vm445_vm2, %v824_v27  ;;  %3847 = vmatprep.mubr.msk.bf16.mxu1 %vm445_vm2, %v4328_v39  ;;  %v832_v39 = vsel %vm819_vm3, %v829_v56, %v831_v58  ;;  %v1523_v27 = vrot.slane %v1521_v46, 1  ;;  %v4555_v56 = vld [vmem:[%s4273_s25 + $0x40] sm:$0xff]   ;;  %v4611_v46 = vld [vmem:[%s4273_s25 + $0x70] sm:$0xff]  }
  0x3e   : > { %3928 = vmatpush3.bf16.msra.mxu0 %v1648_v45  ;;  %3873 = vmatprep.mubr.msk.bf16.mxu0 %vm445_vm2, %v826_v55  ;;  %v834_v59 = vsel %vm819_vm3, %v831_v58, %v833_v28  ;;  %v836_v61 = vsel %vm819_vm3, %v833_v28, %v835_v60  ;;  %v4550_v45 = vld [vmem:[%s4273_s25 + $0x38] sm:$0xff]   ;;  %v1533_v58 = vshrl.u32 %v4528_v43, 16  ;;  %v4140_v28 = vld [vmem:[%s4273_s25 + $0x30] sm:$0xff]  }
  0x3f   : > { %4086 = vmatprep.subr.msk.bf16.mxu0 %vm488_vm0, %v4430_v7  ;;  %v1527_v7 = vor.u32 %v1525_v52, %v1523_v27 }
  0x44   : > { %3848 = vmatmul.mubr.msk.bf16.gmra.mxu1 %vm445_vm2, %v4345_v50  ;;  %v837_v50 = vrot.slane %v4294_v14, 1 }
  0x45   : > { %3874 = vmatmul.mubr.msk.bf16.gmra.mxu0 %vm445_vm2, %v828_v33  ;;  %3851 = vmatprep.mubr.msk.bf16.mxu1 %vm445_vm2, %v4370_v10  ;;  %v4484_v10 = vld [vmem:[%s4273_s25 + $0x10] sm:$0xff]   ;;  %v1537_v33 = vshll.u32 %v4550_v45, 16 }
  0x46   : > { %3877 = vmatprep.mubr.msk.bf16.mxu0 %vm445_vm2, %v830_v57  ;;  %v838_v63 = vsel %vm819_vm3, %v835_v60, %v837_v50  ;;  %v1497_v18 = vshll.u32 %v4484_v10, 16  ;;  %v1501_v29 = vshrl.u32 %v4484_v10, 16  ;;  %v1545_v60 = vshll.u32 %v4555_v56, 16 }
  0x48   : > { %v1499_v22 = vrot.slane %v1497_v18, 1 }
  0x4a   : > { %v1503_v38 = vor.u32 %v1501_v29, %v1499_v22 }
  0x4c   : > { %3852 = vmatmul.mubr.msk.bf16.gmra.mxu1 %vm445_vm2, %v4373_v11  ;;  %v1492_v11 = vshll.u32 %v3493_v4, 16  ;;  %v1508_v47 = vsel %vm328_vm1, %v1503_v38, %v1507_v35  ;;  %v4606_v35 = vld [vmem:[%s4273_s25 + $0x68] sm:$0xff]  }
  0x4d   : > { %3878 = vmatmul.mubr.msk.bf16.gmra.mxu0 %vm445_vm2, %v832_v39  ;;  %3855 = vmatprep.mubr.msk.bf16.mxu1 %vm445_vm2, %v4291_v13  ;;  %v840_v13 = vsel %vm819_vm3, %v837_v50, %v839_v0  ;;  %v1532_v39 = vsel %vm328_vm1, %v1527_v7, %v1531_v15  ;;  %v4142_v50 = vld [vmem:[%s4273_s25 + $0x38] sm:$0xff]   ;;  %v1535_v0 = vor.u32 %v1533_v58, %v1531_v15  ;;  %v1589_v53 = vshrl.u32 %v4606_v35, 16 }
  0x4e   : > { %3881 = vmatprep.mubr.msk.bf16.mxu0 %vm445_vm2, %v834_v59  ;;  %v1494_v16 = vrot.slane %v1492_v11, 1  ;;  %v1541_v59 = vshrl.u32 %v4550_v45, 16 }
  0x54   : > { %3856 = vmatmul.mubr.msk.bf16.gmra.mxu1 %vm445_vm2, %v4294_v14  ;;  %v843_v14 = vrot.slane %v4333_v44, 1 }
  0x55   : > { %3882 = vmatmul.mubr.msk.bf16.gmra.mxu0 %vm445_vm2, %v836_v61  ;;  %3859 = vmatprep.mubr.msk.bf16.mxu1 %vm445_vm2, %v4306_v24  ;;  %v1539_v61 = vrot.slane %v1537_v33, 1  ;;  %v4627_v33 = vld [vmem:[%s4273_s25 + $0x78] ss:$0 sps:$4 sm:$0x11]  }
  0x56   : > { %3885 = vmatprep.mubr.msk.bf16.mxu0 %vm445_vm2, %v838_v63  ;;  %v844_v24 = vsel %vm819_vm3, %v841_v2, %v843_v14  ;;  %v846_v19 = vsel %vm819_vm3, %v843_v14, %v845_v9  ;;  %v4570_v63 = vld [vmem:[%s4273_s25 + $0x48] sm:$0xff]   ;;  %v1547_v2 = vrot.slane %v1545_v60, 1  ;;  %v1549_v14 = vshrl.u32 %v4555_v56, 16 }
  0x57   : > { %v1543_v1 = vor.u32 %v1541_v59, %v1539_v61  ;;  %v1553_v4 = vshll.u32 %v4570_v63, 16  ;;  %v1597_v60 = vshrl.u32 %v4611_v46, 16 }
  0x59   : > { %v1548_v11 = vsel %vm328_vm1, %v1543_v1, %v1547_v2  ;;  %v1555_v18 = vrot.slane %v1553_v4, 1  ;;  %v1834_v4 = vrot.slane %v4503_v23, 1 }
  0x5c   : > { %3860 = vmatmul.mubr.msk.bf16.gmra.mxu1 %vm445_vm2, %v4324_v37  ;;  %v847_v37 = vrot.slane %v4377_v17, 1 }
  0x5d   : > { %3886 = vmatmul.mubr.msk.bf16.gmra.mxu0 %vm445_vm2, %v840_v13  ;;  %3863 = vmatprep.mubr.msk.bf16.mxu1 %vm445_vm2, %v4333_v44  ;;  %v1495_v44 = vor.u32 %v1494_v16, %v1490_v12  ;;  %v4575_v13 = vld [vmem:[%s4273_s25 + $0x50] sm:$0xff]   ;;  %v4146_v16 = vld [vmem:[%s4273_s25 + $0x48] sm:$0xff]  }
  0x5e   : > { %3889 = vmatprep.mubr.msk.bf16.mxu0 %vm445_vm2, %v842_v8  ;;  %v848_v26 = vsel %vm819_vm3, %v845_v9, %v847_v37  ;;  %v1540_v8 = vsel %vm328_vm1, %v1535_v0, %v1539_v61  ;;  %v4144_v9 = vld [vmem:[%s4273_s25 + $0x40] sm:$0xff]   ;;  %v1561_v12 = vshll.u32 %v4575_v13, 16  ;;  %v1565_v29 = vshrl.u32 %v4575_v13, 16 }
  0x5f   : > { %v1500_v17 = vsel %vm328_vm1, %v1495_v44, %v1499_v22  ;;  %v4593_v22 = vld [vmem:[%s4273_s25 + $0x60] sm:$0xff]  }
  0x60   : > { %v1563_v44 = vrot.slane %v1561_v12, 1  ;;  %v1838_v12 = vrot.slane %v4528_v43, 1  ;;  %v4164_v43 = vld [vmem:[%s4273_s25 + $0x28] sm:$0xff]  }
  0x62   : > { %v1567_v38 = vor.u32 %v1565_v29, %v1563_v44  ;;  %v4167_v29 = vld [vmem:[%s4273_s25 + $0x40] sm:$0xff]  }
  0x64   : > { %3864 = vmatmul.mubr.msk.bf16.gmra.mxu1 %vm445_vm2, %v4360_v62  ;;  %v1513_v62 = vshll.u32 %v4503_v23, 16  ;;  %v4162_v23 = vld [vmem:[%s4273_s25 + $0x18] sm:$0xff]  }
  0x65   : > { %3890 = vmatmul.mubr.msk.bf16.gmra.mxu0 %vm445_vm2, %v844_v24  ;;  %3899 = vmatprep.mubr.msk.bf16.mxu1 %vm445_vm2, %v4131_v20  ;;  %v1557_v24 = vshrl.u32 %v4570_v63, 16  ;;  %v1551_v20 = vor.u32 %v1549_v14, %v1547_v2  ;;  %v4161_v14 = vld [vmem:[%s4273_s25 + $0x10] sm:$0xff]  }
  0x66   : > { %3893 = vmatprep.mubr.msk.bf16.mxu0 %vm445_vm2, %v846_v19  ;;  %v1515_v42 = vrot.slane %v1513_v62, 1  ;;  %v4588_v19 = vld [vmem:[%s4273_s25 + $0x58] sm:$0xff]   ;;  %v1577_v62 = vshll.u32 %v4593_v22, 16 }
  0x67   : > { %v1559_v37 = vor.u32 %v1557_v24, %v1555_v18  ;;  %v1569_v25 = vshll.u32 %v4588_v19, 16  ;;  %v1573_v31 = vshrl.u32 %v4588_v19, 16 }
  0x68   : > { %v1516_v5 = vsel %vm328_vm1, %v1511_v41, %v1515_v42  ;;  %v1519_v55 = vor.u32 %v1517_v48, %v1515_v42  ;;  %v1579_v42 = vrot.slane %v1577_v62, 1  ;;  %v4169_v62 = vld [vmem:[%s4273_s25 + $0x50] sm:$0xff]  }
  0x6a   : > { %v1524_v57 = vsel %vm328_vm1, %v1519_v55, %v1523_v27  ;;  %v4154_v27 = vld [vmem:[%s4273_s25 + $0x68] sm:$0xff]  }
  0x6c   : > { %3900 = vmatmul.mubr.msk.bf16.vlgmr.msra.gmra.mxu1 %vm445_vm2, %v4132_v30  ;;  %v4148_v30 = vld [vmem:[%s4273_s25 + $0x50] sm:$0xff]  }
  0x6d   : > { %3894 = vmatmul.mubr.msk.bf16.gmra.mxu0 %vm445_vm2, %v848_v26  ;;  %3958 = vmatpush3.bf16.msra.mxu1 %v1901_v34  ;;  %v1556_v26 = vsel %vm328_vm1, %v1551_v20, %v1555_v18  ;;  %v1571_v34 = vrot.slane %v1569_v25, 1 }
  0x6e   : > { %3929 = vmatprep.mubr.msk.bf16.mxu0 %vm445_vm2, %v1500_v17  ;;  %3903 = vmatprep.mubr.msk.bf16.mxu1 %vm445_vm2, %v4133_v32  ;;  %v1564_v17 = vsel %vm328_vm1, %v1559_v37, %v1563_v44  ;;  %v4150_v32 = vld [vmem:[%s4273_s25 + $0x58] sm:$0xff]   ;;  %v4165_v37 = vld [vmem:[%s4273_s25 + $0x30] sm:$0xff]  }
  0x6f   : > { %4087 = vmatprep.subr.msk.bf16.mxu1 %vm488_vm0, %v4524_v40  ;;  %v1575_v41 = vor.u32 %v1573_v31, %v1571_v34  ;;  %v1572_v48 = vsel %vm328_vm1, %v1567_v38, %v1571_v34  ;;  %v1848_v31 = vrot.slane %v4588_v19, 1  ;;  %v2395_v34 = vld [vmem:[%s4273_s25 + $0x14] sm:$0xf]  ;;  %v1852_v19 = vrot.slane %v4606_v35, 1 }
  0x71   : > { %v1580_v52 = vsel %vm328_vm1, %v1575_v41, %v1579_v42 }
  0x74   : > { %3904 = vmatmul.mubr.msk.bf16.gmra.mxu1 %vm445_vm2, %v4136_v49  ;;  %v1581_v49 = vshrl.u32 %v4593_v22, 16 }
  0x75   : > { %3930 = vmatmul.mubr.msk.bf16.vlgmr.msra.gmra.mxu0 %vm445_vm2, %v1508_v47  ;;  %3907 = vmatprep.mubr.msk.bf16.mxu1 %vm445_vm2, %v4138_v54  ;;  %v1585_v47 = vshll.u32 %v4606_v35, 16  ;;  %v1593_v54 = vshll.u32 %v4611_v46, 16 }
  0x76   : > { %3988 = vmatpush3.bf16.msra.mxu0 %v2219_v51  ;;  %3933 = vmatprep.mubr.msk.bf16.mxu0 %vm445_vm2, %v1516_v5  ;;  %v1823_v51 = vld [vmem:[%s4273_s25 + $0x8] sm:$0xe]  ;;  %v4152_v5 = vld [vmem:[%s4273_s25 + $0x60] sm:$0xff]   ;;  %v1583_v15 = vor.u32 %v1581_v49, %v1579_v42 }
  0x77   : > { %4088 = vmatprep.subr.msk.bf16.mxu0 %vm488_vm0, %v4546_v6  ;;  %v1587_v55 = vrot.slane %v1585_v47, 1  ;;  %v3523_v7 = vcombine.low %v1823_v51, %v4472_v3  ;;  %v1595_v58 = vrot.slane %v1593_v54, 1  ;;  %v1601_v3 = vshll.u32 %v4627_v33, 16  ;;  %v4171_v51 = vld [vmem:[%s4273_s25 + $0x60] sm:$0xff]  }
  0x78   : > { %v1854_v47 = vrot.slane %v4611_v46, 1  ;;  %v4177_v46 = vld [vmem:[%s4273_s25 + $0x20] sm:$0xff]  }
  0x79   : > { %v1588_v59 = vsel %vm328_vm1, %v1583_v15, %v1587_v55  ;;  %v1599_v1 = vor.u32 %v1597_v60, %v1595_v58  ;;  %v1603_v2 = vrot.slane %v1601_v3, 1 }
  0x7c   : > { %3908 = vmatmul.mubr.msk.bf16.gmra.mxu1 %vm445_vm2, %v4140_v28  ;;  %v1829_v28 = vrot.slane %v3523_v7, 1  ;;  %v4172_v7 = vld [vmem:[%s4273_s25 + $0x68] sm:$0xff]  }
  0x7d   : > { %3934 = vmatmul.mubr.msk.bf16.gmra.mxu0 %vm445_vm2, %v1524_v57  ;;  %3911 = vmatprep.mubr.msk.bf16.mxu1 %vm445_vm2, %v4142_v50  ;;  %v1591_v57 = vor.u32 %v1589_v53, %v1587_v55  ;;  %v4156_v50 = vld [vmem:[%s4273_s25 + $0x70] sm:$0xff]  }
  0x7e   : > { %3937 = vmatprep.mubr.msk.bf16.mxu0 %vm445_vm2, %v1532_v39  ;;  %v1830_v39 = vrot.slane %v4484_v10, 1  ;;  %v1832_v10 = vrot.slane %v4496_v21, 1  ;;  %v1836_v21 = vrot.slane %v4518_v36, 1  ;;  %v1840_v36 = vrot.slane %v4550_v45, 1  ;;  %v2832_v55 = vld [vmem:[%s4273_s25 + $0x10] sm:$0xe] }
  0x7f   : > { %v1596_v61 = vsel %vm328_vm1, %v1591_v57, %v1595_v58  ;;  %v1844_v45 = vrot.slane %v4570_v63, 1  ;;  %v4168_v63 = vld [vmem:[%s4273_s25 + $0x48] sm:$0xff]  }
  0x80   : > { %v1831_v0 = vsel %vm819_vm3, %v1829_v28, %v1830_v39  ;;  %v1835_v24 = vsel %vm819_vm3, %v1832_v10, %v1834_v4  ;;  %v1837_v18 = vsel %vm819_vm3, %v1834_v4, %v1836_v21  ;;  %v1839_v20 = vsel %vm819_vm3, %v1836_v21, %v1838_v12  ;;  %v4717_v58 = vld [vmem:[%s4273_s25 + $0x28] sm:$0xff]   ;;  %v4173_v28 = vld [vmem:[%s4273_s25 + $0x70] sm:$0xff]  }
  0x81   : > { %v1841_v44 = vsel %vm819_vm3, %v1838_v12, %v1840_v36  ;;  %v2526_v12 = vshrl.u32 %v4717_v58, 16 }
  0x84   : > { %3912 = vmatmul.mubr.msk.bf16.gmra.mxu1 %vm445_vm2, %v4144_v9  ;;  %v1833_v9 = vsel %vm819_vm3, %v1830_v39, %v1832_v10  ;;  %v2514_v39 = vshll.u32 %v4177_v46, 16  ;;  %v4729_v10 = vld [vmem:[%s4273_s25 + $0x30] sm:$0xff]  }
  0x85   : > { %3938 = vmatmul.mubr.msk.bf16.gmra.mxu0 %vm445_vm2, %v1540_v8  ;;  %3915 = vmatprep.mubr.msk.bf16.mxu1 %vm445_vm2, %v4146_v16  ;;  %v1604_v8 = vsel %vm328_vm1, %v1599_v1, %v1603_v2  ;;  %v4163_v16 = vld [vmem:[%s4273_s25 + $0x20] sm:$0xff]   ;;  %v2530_v21 = vshll.u32 %v4729_v10, 16 }
  0x86   : > { %3941 = vmatprep.mubr.msk.bf16.mxu0 %vm445_vm2, %v1548_v11  ;;  %v2657_v11 = vsel %vm488_vm0, %v4524_v40, 0  ;;  %v2910_v40 = vsel %vm488_vm0, %v4546_v6, 0  ;;  %v1842_v6 = vrot.slane %v4555_v56, 1  ;;  %v4166_v56 = vld [vmem:[%s4273_s25 + $0x38] sm:$0xff]  }
  0x88   : > { %v1843_v25 = vsel %vm819_vm3, %v1840_v36, %v1842_v6  ;;  %v2841_v36 = vrot.slane %v4177_v46, 1 }
  0x8c   : > { %3916 = vmatmul.mubr.msk.bf16.gmra.mxu1 %vm445_vm2, %v4148_v30  ;;  %v1845_v30 = vsel %vm819_vm3, %v1842_v6, %v1844_v45 }
  0x8d   : > { %3942 = vmatmul.mubr.msk.bf16.gmra.mxu0 %vm445_vm2, %v1556_v26  ;;  %3919 = vmatprep.mubr.msk.bf16.mxu1 %vm445_vm2, %v4150_v32  ;;  %v1846_v26 = vrot.slane %v4575_v13, 1  ;;  %v1850_v13 = vrot.slane %v4593_v22, 1  ;;  %v2394_v32 = vld [vmem:[%s4273_s25 + $0x10] sm:$0xf]  ;;  %v4170_v22 = vld [vmem:[%s4273_s25 + $0x58] sm:$0xff]  }
  0x8e   : > { %3945 = vmatprep.mubr.msk.bf16.mxu0 %vm445_vm2, %v1564_v17  ;;  %v3568_v42 = vcombine.low %v2394_v32, %v2395_v34 }
  0x8f   : > { %v1847_v17 = vsel %vm819_vm3, %v1844_v45, %v1846_v26  ;;  %v1849_v38 = vsel %vm819_vm3, %v1846_v26, %v1848_v31  ;;  %v1851_v41 = vsel %vm819_vm3, %v1848_v31, %v1850_v13 }
  0x90   : > { %v2501_v49 = vshll.u32 %v3568_v42, 16  ;;  %v2499_v53 = vshrl.u32 %v3568_v42, 16 }
  0x92   : > { %v2503_v54 = vrot.slane %v2501_v49, 1 }
  0x94   : > { %3920 = vmatmul.mubr.msk.bf16.gmra.mxu1 %vm445_vm2, %v4152_v5  ;;  %v1853_v5 = vsel %vm819_vm3, %v1850_v13, %v1852_v19  ;;  %v2504_v15 = vor.u32 %v2503_v54, %v2499_v53  ;;  %v4790_v53 = vld [vmem:[%s4273_s25 + $0x50] sm:$0xff]  }
  0x95   : > { %3946 = vmatmul.mubr.msk.bf16.gmra.mxu0 %vm445_vm2, %v1572_v48  ;;  %3923 = vmatprep.mubr.msk.bf16.mxu1 %vm445_vm2, %v4154_v27  ;;  %v4702_v48 = vld [vmem:[%s4273_s25 + $0x18] sm:$0xff]   ;;  %v1856_v27 = vrot.slane %v4627_v33, 1 }
  0x96   : > { %3949 = vmatprep.mubr.msk.bf16.mxu0 %vm445_vm2, %v1580_v52  ;;  %v1855_v52 = vsel %vm819_vm3, %v1852_v19, %v1854_v47  ;;  %v2506_v35 = vshll.u32 %v4702_v48, 16  ;;  %v2510_v3 = vshrl.u32 %v4702_v48, 16  ;;  %v2839_v2 = vrot.slane %v4702_v48, 1 }
  0x97   : > { %v1857_v60 = vsel %vm819_vm3, %v1854_v47, %v1856_v27  ;;  %v2845_v48 = vrot.slane %v4729_v10, 1 }
  0x98   : > { %v2508_v57 = vrot.slane %v2506_v35, 1  ;;  %v2842_v31 = vsel %vm819_vm3, %v2839_v2, %v2841_v36 }
  0x9a   : > { %v2509_v33 = vsel %vm328_vm1, %v2504_v15, %v2508_v57  ;;  %v2512_v4 = vor.u32 %v2510_v3, %v2508_v57 }
  0x9c   : > { %3924 = vmatmul.mubr.msk.bf16.gmra.mxu1 %vm445_vm2, %v4156_v50  ;;  %v2518_v50 = vshrl.u32 %v4177_v46, 16 }
  0x9d   : > { %3950 = vmatmul.mubr.msk.bf16.gmra.mxu0 %vm445_vm2, %v1588_v59  ;;  %3959 = vmatprep.mubr.msk.bf16.mxu1 %vm445_vm2, %v1831_v0  ;;  %v3598_v59 = vcombine.low %v2832_v55, %v2395_v34  ;;  %v2516_v0 = vrot.slane %v2514_v39, 1  ;;  %v2562_v39 = vshll.u32 %v4790_v53, 16 }
  0x9e   : > { %3953 = vmatprep.mubr.msk.bf16.mxu0 %vm445_vm2, %v1596_v61  ;;  %v2522_v61 = vshll.u32 %v4717_v58, 16 }
  0x9f   : > { %v2838_v1 = vrot.slane %v3598_v59, 1 }
  0xa4   : > { %3960 = vmatmul.mubr.msk.bf16.vlgmr.msra.gmra.mxu1 %vm445_vm2, %v1833_v9  ;;  %v2524_v9 = vrot.slane %v2522_v61, 1  ;;  %v2566_v61 = vshrl.u32 %v4790_v53, 16 }
  0xa5   : > { %3954 = vmatmul.mubr.msk.bf16.gmra.mxu0 %vm445_vm2, %v1604_v8  ;;  %4018 = vmatpush3.bf16.msra.mxu1 %v2657_v11  ;;  %v4176_v8 = vld [vmem:[%s4273_s25 + $0x78] sm:$0xff]  }
  0xa6   : > { %3989 = vmatprep.mubr.msk.bf16.mxu0 %vm445_vm2, %v4161_v14  ;;  %3963 = vmatprep.mubr.msk.bf16.mxu1 %vm445_vm2, %v1835_v24  ;;  %v2520_v14 = vor.u32 %v2518_v50, %v2516_v0  ;;  %v4734_v11 = vld [vmem:[%s4273_s25 + $0x38] sm:$0xff]   ;;  %v2840_v24 = vsel %vm819_vm3, %v2838_v1, %v2839_v2  ;;  %v2528_v45 = vor.u32 %v2526_v12, %v2524_v9  ;;  %v4834_v12 = vld [vmem:[%s4273_s25 + $0x68] sm:$0xff]  }
  0xac   : > { %3964 = vmatmul.mubr.msk.bf16.gmra.mxu1 %vm445_vm2, %v1837_v18  ;;  %v2534_v18 = vshrl.u32 %v4729_v10, 16 }
  0xad   : > { %3990 = vmatmul.mubr.msk.bf16.vlgmr.msra.gmra.mxu0 %vm445_vm2, %v4162_v23  ;;  %3967 = vmatprep.mubr.msk.bf16.mxu1 %vm445_vm2, %v1839_v20  ;;  %v2517_v23 = vsel %vm328_vm1, %v2512_v4, %v2516_v0  ;;  %v2538_v20 = vshll.u32 %v4734_v11, 16  ;;  %v2564_v4 = vrot.slane %v2562_v39, 1  ;;  %v2590_v39 = vshrl.u32 %v4834_v12, 16 }
  0xae   : > { %4048 = vmatpush3.bf16.msra.mxu0 %v2910_v40  ;;  %3993 = vmatprep.mubr.msk.bf16.mxu0 %vm445_vm2, %v4163_v16  ;;  %v2525_v40 = vsel %vm328_vm1, %v2520_v14, %v2524_v9  ;;  %v4826_v14 = vld [vmem:[%s4273_s25 + $0x60] sm:$0xff]  }
  0xb4   : > { %3968 = vmatmul.mubr.msk.bf16.gmra.mxu1 %vm445_vm2, %v1841_v44  ;;  %v2843_v44 = vrot.slane %v4717_v58, 1 }
  0xb5   : > { %3994 = vmatmul.mubr.msk.bf16.gmra.mxu0 %vm445_vm2, %v4164_v43  ;;  %3971 = vmatprep.mubr.msk.bf16.mxu1 %vm445_vm2, %v1843_v25  ;;  %v4754_v25 = vld [vmem:[%s4273_s25 + $0x40] sm:$0xff]  }
  0xb6   : > { %3997 = vmatprep.mubr.msk.bf16.mxu0 %vm445_vm2, %v4165_v37  ;;  %v2532_v37 = vrot.slane %v2530_v21, 1  ;;  %v2546_v32 = vshll.u32 %v4754_v25, 16  ;;  %v2846_v15 = vsel %vm819_vm3, %v2843_v44, %v2845_v48  ;;  %v2849_v1 = vrot.slane %v4754_v25, 1 }
  0xb7   : > { %v2568_v21 = vor.u32 %v2566_v61, %v2564_v4 }
  0xb8   : > { %v2533_v34 = vsel %vm328_vm1, %v2528_v45, %v2532_v37 }
  0xbc   : > { %3972 = vmatmul.mubr.msk.bf16.gmra.mxu1 %vm445_vm2, %v1845_v30  ;;  %v2540_v30 = vrot.slane %v2538_v20, 1 }
  0xbd   : > { %3998 = vmatmul.mubr.msk.bf16.gmra.mxu0 %vm445_vm2, %v4166_v56  ;;  %3975 = vmatprep.mubr.msk.bf16.mxu1 %vm445_vm2, %v1847_v17  ;;  %v4762_v17 = vld [vmem:[%s4273_s25 + $0x48] sm:$0xff]  }
  0xbe   : > { %4001 = vmatprep.mubr.msk.bf16.mxu0 %vm445_vm2, %v4167_v29  ;;  %v2536_v29 = vor.u32 %v2534_v18, %v2532_v37  ;;  %v2554_v47 = vshll.u32 %v4762_v17, 16  ;;  %v2578_v37 = vshll.u32 %v4826_v14, 16 }
  0xc0   : > { %v2541_v19 = vsel %vm328_vm1, %v2536_v29, %v2540_v30  ;;  %v2556_v55 = vrot.slane %v2554_v47, 1 }
  0xc4   : > { %3976 = vmatmul.mubr.msk.bf16.gmra.mxu1 %vm445_vm2, %v1849_v38  ;;  %v2542_v38 = vshrl.u32 %v4734_v11, 16 }
  0xc5   : > { %4002 = vmatmul.mubr.msk.bf16.gmra.mxu0 %vm445_vm2, %v4168_v63  ;;  %3979 = vmatprep.mubr.msk.bf16.mxu1 %vm445_vm2, %v1851_v41 }
  0xc6   : > { %4005 = vmatprep.mubr.msk.bf16.mxu0 %vm445_vm2, %v4169_v62  ;;  %v2844_v62 = vsel %vm819_vm3, %v2841_v36, %v2843_v44  ;;  %v2544_v54 = vor.u32 %v2542_v38, %v2540_v30  ;;  %v2580_v38 = vrot.slane %v2578_v37, 1  ;;  %v2859_v37 = vrot.slane %v4834_v12, 1 }
  0xcc   : > { %3980 = vmatmul.mubr.msk.bf16.gmra.mxu1 %vm445_vm2, %v1853_v5  ;;  %v2548_v5 = vrot.slane %v2546_v32, 1 }
  0xcd   : > { %4006 = vmatmul.mubr.msk.bf16.gmra.mxu0 %vm445_vm2, %v4170_v22  ;;  %3983 = vmatprep.mubr.msk.bf16.mxu1 %vm445_vm2, %v1855_v52  ;;  %v2550_v22 = vshrl.u32 %v4754_v25, 16  ;;  %v2847_v52 = vrot.slane %v4734_v11, 1 }
  0xce   : > { %4009 = vmatprep.mubr.msk.bf16.mxu0 %vm445_vm2, %v4171_v51  ;;  %v2549_v59 = vsel %vm328_vm1, %v2544_v54, %v2548_v5 }
  0xcf   : > { %v2552_v27 = vor.u32 %v2550_v22, %v2548_v5  ;;  %v4860_v22 = vld [vmem:[%s4273_s25 + $0x70] sm:$0xff]  }
  0xd1   : > { %v2557_v50 = vsel %vm328_vm1, %v2552_v27, %v2556_v55  ;;  %v4867_v27 = vld [vmem:[%s4273_s25 + $0x78] sm:$0xff]  }
  0xd4   : > { %3984 = vmatmul.mubr.msk.bf16.gmra.mxu1 %vm445_vm2, %v1857_v60  ;;  %v2558_v60 = vshrl.u32 %v4762_v17, 16 }
  0xd5   : > { %4010 = vmatmul.mubr.msk.bf16.gmra.mxu0 %vm445_vm2, %v4172_v7  ;;  %4019 = vmatprep.mubr.msk.bf16.mxu1 %vm445_vm2, %v2509_v33  ;;  %v4798_v7 = vld [vmem:[%s4273_s25 + $0x58] sm:$0xff]  }
  0xd6   : > { %4013 = vmatprep.mubr.msk.bf16.mxu0 %vm445_vm2, %v4173_v28  ;;  %v2848_v28 = vsel %vm819_vm3, %v2845_v48, %v2847_v52  ;;  %v2570_v0 = vshll.u32 %v4798_v7, 16  ;;  %v2560_v9 = vor.u32 %v2558_v60, %v2556_v55  ;;  %v2574_v25 = vshrl.u32 %v4798_v7, 16 }
  0xd8   : > { %v2565_v44 = vsel %vm328_vm1, %v2560_v9, %v2564_v4  ;;  %v2602_v4 = vshll.u32 %v4867_v27, 16 }
  0xdc   : > { %v4747_v43 = vpop.f32.mrf.mxu1  ;;  %4020 = vmatmul.mubr.msk.bf16.vlgmr.msra.gmra.mxu1 %vm445_vm2, %v2517_v23  ;;  %v2572_v23 = vrot.slane %v2570_v0, 1 }
  0xdd   : > { %v4740_v16 = vpop.f32.mrf.mxu0  ;;  %4014 = vmatmul.mubr.msk.bf16.gmra.mxu0 %vm445_vm2, %v4176_v8  ;;  %4023 = vmatprep.mubr.msk.bf16.mxu1 %vm445_vm2, %v2525_v40  ;;  %v2851_v8 = vrot.slane %v4762_v17, 1  ;;  %v2850_v40 = vsel %vm819_vm3, %v2847_v52, %v2849_v1  ;;  %v2582_v17 = vshrl.u32 %v4826_v14, 16 }
  0xde   : > { %4049 = vmatprep.mubr.msk.bf16.mxu0 %vm445_vm2, %v2840_v24  ;;  %v4757_v56 = vpop.f32.mrf.mxu1  ;;  %v2573_v30 = vsel %vm328_vm1, %v2568_v21, %v2572_v23  ;;  %v2576_v48 = vor.u32 %v2574_v25, %v2572_v23 }
  0xdf   : > { %v4750_v6 = vpop.f32.mrf.mxu0  ;;  %v2852_v36 = vsel %vm819_vm3, %v2849_v1, %v2851_v8  ;;  %v2584_v54 = vor.u32 %v2582_v17, %v2580_v38  ;;  %v2598_v1 = vshrl.u32 %v4860_v22, 16 }
  0xe0   : > { %v4765_v63 = vpop.f32.mrf.mxu1 }
  0xe1   : > { %v4759_v26 = vpop.f32.mrf.mxu0 }
  0xe2   : > { %v4773_v41 = vpop.f32.mrf.mxu1 }
  0xe3   : > { %v4767_v13 = vpop.f32.mrf.mxu0 }
  0xe4   : > { %v4783_v49 = vpop.f32.mrf.mxu1  ;;  %4024 = vmatmul.mubr.msk.bf16.gmra.mxu1 %vm445_vm2, %v2533_v34 }
  0xe5   : > { %v4775_v42 = vpop.f32.mrf.mxu0  ;;  %4050 = vmatmul.mubr.msk.bf16.vlgmr.msra.gmra.mxu0 %vm445_vm2, %v2842_v31  ;;  %4027 = vmatprep.mubr.msk.bf16.mxu1 %vm445_vm2, %v2541_v19  ;;  %v2586_v31 = vshll.u32 %v4834_v12, 16  ;;  %v2855_v19 = vrot.slane %v4798_v7, 1 }
  0xe6   : > { %4053 = vmatprep.mubr.msk.bf16.mxu0 %vm445_vm2, %v2844_v62  ;;  %v4793_v35 = vpop.f32.mrf.mxu1  ;;  %v2853_v62 = vrot.slane %v4790_v53, 1 }
  0xe7   : > { %v4786_v51 = vpop.f32.mrf.mxu0  ;;  %v2588_v53 = vrot.slane %v2586_v31, 1 }
  0xe8   : > { %v4801_v57 = vpop.f32.mrf.mxu1 }
  0xe9   : > { %v4795_v46 = vpop.f32.mrf.mxu0 }
  0xea   : > { %v4809_v3 = vpop.f32.mrf.mxu1 }
  0xeb   : > { %v4803_v58 = vpop.f32.mrf.mxu0 }
  0xec   : > { %v4819_v2 = vpop.f32.mrf.mxu1  ;;  %4028 = vmatmul.mubr.msk.bf16.gmra.mxu1 %vm445_vm2, %v2549_v59  ;;  %v2594_v59 = vshll.u32 %v4860_v22, 16 }
  0xed   : > { %v4811_v33 = vpop.f32.mrf.mxu0  ;;  %4054 = vmatmul.mubr.msk.bf16.gmra.mxu0 %vm445_vm2, %v2846_v15  ;;  %4031 = vmatprep.mubr.msk.bf16.mxu1 %vm445_vm2, %v2557_v50  ;;  %v2854_v15 = vsel %vm819_vm3, %v2851_v8, %v2853_v62  ;;  %v2581_v50 = vsel %vm328_vm1, %v2576_v48, %v2580_v38 }
  0xee   : > { %4057 = vmatprep.mubr.msk.bf16.mxu0 %vm445_vm2, %v2848_v28  ;;  %v4829_v11 = vpop.f32.mrf.mxu1 }
  0xef   : > { %v4822_v10 = vpop.f32.mrf.mxu0 }
  0xf0   : > { %v4837_v18 = vpop.f32.mrf.mxu1 }
  0xf1   : > { %v4831_v24 = vpop.f32.mrf.mxu0 }
  0xf2   : > { %v4845_v45 = vpop.f32.mrf.mxu1 }
  0xf3   : > { %v4839_v20 = vpop.f32.mrf.mxu0 }
  0xf4   : > { %v3841_v32 = vpop.f32.mrf.mxu1  ;;  %4032 = vmatmul.mubr.msk.bf16.gmra.mxu1 %vm445_vm2, %v2565_v44 }
  0xf5   : > { %v4847_v29 = vpop.f32.mrf.mxu0  ;;  %4058 = vmatmul.mubr.msk.bf16.gmra.mxu0 %vm445_vm2, %v2850_v40  ;;  %v711_v47 = vadd.f32 %v3841_v32, %v4740_v16  ;;  %4035 = vmatprep.mubr.msk.bf16.mxu1 %vm445_vm2, %v2573_v30  ;;  %v2856_v16 = vsel %vm819_vm3, %v2853_v62, %v2855_v19  ;;  %v2592_v40 = vor.u32 %v2590_v39, %v2588_v53  ;;  %v2604_v62 = vrot.slane %v2602_v4, 1 }
  0xf6   : > { %4061 = vmatprep.mubr.msk.bf16.mxu0 %vm445_vm2, %v2852_v36  ;;  %v702_v5 = vpop.f32.mrf.mxu1  ;;  %v2596_v36 = vrot.slane %v2594_v59, 1 }
  0xf7   : > { %v4856_v34 = vpop.f32.mrf.mxu0  ;;  %v703_v55 = vadd.f32 %v702_v5, %v4750_v6  ;;  %v2589_v6 = vsel %vm328_vm1, %v2584_v54, %v2588_v53  ;;  %v2606_v53 = vshrl.u32 %v4867_v27, 16 }
  0xf8   : > { %v3842_v28 = vpop.f32.mrf.mxu1  ;;  %v2600_v31 = vor.u32 %v2598_v1, %v2596_v36  ;;  %v2597_v12 = vsel %vm328_vm1, %v2592_v40, %v2596_v36 }
  0xf9   : > { %v4864_v52 = vpop.f32.mrf.mxu0  ;;  %v714_v60 = vadd.f32 %v3842_v28, %v4759_v26  ;;  %v2857_v26 = vrot.slane %v4826_v14, 1 }
  0xfa   : > { %v705_v61 = vpop.f32.mrf.mxu1 }
  0xfb   : > { %v4871_v7 = vpop.f32.mrf.mxu0  ;;  %v706_v8 = vadd.f32 %v705_v61, %v4767_v13  ;;  %v4190_v13 = vld [vmem:[%s4273_s25 + $0x80] ss:$0 sps:$4 sm:$0x11]   ;;  %v2858_v38 = vsel %vm819_vm3, %v2855_v19, %v2857_v26 }
  0xfc   : > { %v3845_v21 = vpop.f32.mrf.mxu1  ;;  %4036 = vmatmul.mubr.msk.bf16.gmra.mxu1 %vm445_vm2, %v2581_v50 }
  0xfd   : > { %v3871_v0 = vpop.f32.mrf.mxu0  ;;  %4062 = vmatmul.mubr.msk.bf16.gmra.mxu0 %vm445_vm2, %v2854_v15  ;;  %v727_v44 = vadd.f32 %v3845_v21, %v4775_v42  ;;  %4039 = vmatprep.mubr.msk.bf16.mxu1 %vm445_vm2, %v2589_v6  ;;  %v2860_v42 = vsel %vm819_vm3, %v2857_v26, %v2859_v37 }
  0xfe   : > { %v4883_v9 = vadd.f32 %v3871_v0, %v711_v47  ;;  %4065 = vmatprep.mubr.msk.bf16.mxu0 %vm445_vm2, %v2856_v16  ;;  %v718_v30 = vpop.f32.mrf.mxu1  ;;  %v2861_v16 = vrot.slane %v4860_v22, 1  ;;  %v2608_v0 = vor.u32 %v2606_v53, %v2604_v62 }
  0xff   : > { %v928_v23 = vpop.f32.mrf.mxu0  ;;  %v719_v14 = vadd.f32 %v718_v30, %v4786_v51  ;;  %v2605_v51 = vsel %vm328_vm1, %v2600_v31, %v2604_v62 }
 0x100   : > { %v4890_v25 = vadd.f32 %v928_v23, %v703_v55  ;;  %v3846_v47 = vpop.f32.mrf.mxu1  ;;  %v2610_v55 = vshll.u32 %v4190_v13, 16  ;;  %v2862_v22 = vsel %vm819_vm3, %v2859_v37, %v2861_v16  ;;  %v2865_v37 = vrot.slane %v4190_v13, 1 }
 0x101   : > { %v3872_v17 = vpop.f32.mrf.mxu0  ;;  %v730_v5 = vadd.f32 %v3846_v47, %v4795_v46 }
 0x102   : > { %v4895_v32 = vadd.f32 %v3872_v17, %v714_v60  ;;  %v721_v15 = vpop.f32.mrf.mxu1  ;;  %v2863_v60 = vrot.slane %v4867_v27, 1 }
 0x103   : > { %v931_v48 = vpop.f32.mrf.mxu0  ;;  %v722_v19 = vadd.f32 %v721_v15, %v4803_v58  ;;  %v2612_v58 = vrot.slane %v2610_v55, 1 }
 0x104   : > { %v4901_v54 = vadd.f32 %v931_v48, %v706_v8  ;;  %v3849_v46 = vpop.f32.mrf.mxu1  ;;  %4040 = vmatmul.mubr.msk.bf16.gmra.mxu1 %vm445_vm2, %v2597_v12  ;;  %v2864_v27 = vsel %vm819_vm3, %v2861_v16, %v2863_v60 }
 0x105   : > { %v3875_v28 = vpop.f32.mrf.mxu0  ;;  %4066 = vmatmul.mubr.msk.bf16.gmra.mxu0 %vm445_vm2, %v2858_v38  ;;  %v743_v50 = vadd.f32 %v3849_v46, %v4811_v33  ;;  %4043 = vmatprep.mubr.msk.bf16.mxu1 %vm445_vm2, %v2605_v51  ;;  %v2613_v40 = vsel %vm328_vm1, %v2608_v0, %v2612_v58 }
 0x106   : > { %v4907_v39 = vadd.f32 %v3875_v28, %v727_v44  ;;  %4069 = vmatprep.mubr.msk.bf16.mxu0 %vm445_vm2, %v2860_v42  ;;  %v734_v6 = vpop.f32.mrf.mxu1 }
 0x107   : > { %v944_v59 = vpop.f32.mrf.mxu0  ;;  %v735_v4 = vadd.f32 %v734_v6, %v4822_v10 }
 0x108   : > { %v4914_v61 = vadd.f32 %v944_v59, %v719_v14  ;;  %v3850_v26 = vpop.f32.mrf.mxu1 }
 0x109   : > { %v3876_v1 = vpop.f32.mrf.mxu0  ;;  %v746_v33 = vadd.f32 %v3850_v26, %v4831_v24 }
 0x10a   : > { %v4918_v8 = vadd.f32 %v3876_v1, %v730_v5  ;;  %v737_v36 = vpop.f32.mrf.mxu1 }
 0x10b   : > { %v947_v21 = vpop.f32.mrf.mxu0  ;;  %v738_v10 = vadd.f32 %v737_v36, %v4839_v20  ;;  %v2866_v20 = vsel %vm819_vm3, %v2863_v60, %v2865_v37 }
 0x10c   : > { %v4923_v23 = vadd.f32 %v947_v21, %v722_v19  ;;  %v3853_v17 = vpop.f32.mrf.mxu1  ;;  %4044 = vmatmul.mubr.msk.bf16.gmra.mxu1 %vm445_vm2, %v2613_v40 }
 0x10d   : > { %v3879_v44 = vpop.f32.mrf.mxu0  ;;  %4070 = vmatmul.mubr.msk.bf16.gmra.mxu0 %vm445_vm2, %v2862_v22  ;;  %v759_v24 = vadd.f32 %v3853_v17, %v4847_v29 }
 0x10e   : > { %v4928_v30 = vadd.f32 %v3879_v44, %v743_v50  ;;  %4073 = vmatprep.mubr.msk.bf16.mxu0 %vm445_vm2, %v2864_v27  ;;  %v750_v14 = vpop.f32.mrf.mxu1 }
 0x10f   : > { %v960_v31 = vpop.f32.mrf.mxu0  ;;  %v751_v47 = vadd.f32 %v750_v14, %v4856_v34 }
 0x110   : > { %v4933_v62 = vadd.f32 %v960_v31, %v735_v4  ;;  %v3854_v12 = vpop.f32.mrf.mxu1 }
 0x111   : > { %v3880_v38 = vpop.f32.mrf.mxu0  ;;  %v762_v13 = vadd.f32 %v3854_v12, %v4864_v52 }
 0x112   : > { %v4936_v48 = vadd.f32 %v3880_v38, %v746_v33  ;;  %v753_v53 = vpop.f32.mrf.mxu1 }
 0x113   : > { %v963_v42 = vpop.f32.mrf.mxu0  ;;  %v754_v29 = vadd.f32 %v753_v53, %v4871_v7 }
 0x114   : > { %v4940_v5 = vadd.f32 %v963_v42, %v738_v10  ;;  %v3857_v28 = vpop.f32.mrf.mxu1 }
 0x115   : > { %v3883_v55 = vpop.f32.mrf.mxu0  ;;  %4074 = vmatmul.mubr.msk.bf16.gmra.mxu0 %vm445_vm2, %v2866_v20  ;;  %v775_v51 = vadd.f32 %v3857_v28, %v4747_v43 }
 0x116   : > { %v4944_v15 = vadd.f32 %v3883_v55, %v759_v24  ;;  %v766_v16 = vpop.f32.mrf.mxu1 }
 0x117   : > { %v976_v34 = vpop.f32.mrf.mxu0  ;;  %v767_v52 = vadd.f32 %v766_v16, %v4757_v56 }
 0x118   : > { %v4947_v19 = vadd.f32 %v976_v34, %v751_v47  ;;  %v3858_v60 = vpop.f32.mrf.mxu1 }
 0x119   : > { %v3884_v46 = vpop.f32.mrf.mxu0  ;;  %v778_v0 = vadd.f32 %v3858_v60, %v4765_v63 }
 0x11a   : > { %v4950_v59 = vadd.f32 %v3884_v46, %v762_v13  ;;  %v769_v7 = vpop.f32.mrf.mxu1 }
 0x11b   : > { %v979_v50 = vpop.f32.mrf.mxu0  ;;  %v770_v1 = vadd.f32 %v769_v7, %v4773_v41 }
 0x11c   : > { %v4953_v58 = vadd.f32 %v979_v50, %v754_v29  ;;  %v3861_v43 = vpop.f32.mrf.mxu1 }
 0x11d   : > { %v3887_v6 = vpop.f32.mrf.mxu0  ;;  %v791_v26 = vadd.f32 %v3861_v43, %v4783_v49 }
 0x11e   : > { %v4956_v4 = vadd.f32 %v3887_v6, %v775_v51  ;;  %v782_v56 = vpop.f32.mrf.mxu1 }
 0x11f   : > { %v992_v22 = vpop.f32.mrf.mxu0  ;;  %v783_v33 = vadd.f32 %v782_v56, %v4793_v35 }
 0x120   : > { %v4959_v21 = vadd.f32 %v992_v22, %v767_v52  ;;  %v3862_v63 = vpop.f32.mrf.mxu1 }
 0x121   : > { %v3888_v27 = vpop.f32.mrf.mxu0  ;;  %v794_v44 = vadd.f32 %v3862_v63, %v4801_v57 }
 0x122   : > { %v4962_v40 = vadd.f32 %v3888_v27, %v778_v0  ;;  %v785_v41 = vpop.f32.mrf.mxu1 }
 0x123   : > { %v995_v36 = vpop.f32.mrf.mxu0  ;;  %v786_v17 = vadd.f32 %v785_v41, %v4809_v3 }
 0x124   : > { %v4965_v10 = vadd.f32 %v995_v36, %v770_v1  ;;  %v3865_v49 = vpop.f32.mrf.mxu1 }
 0x125   : > { %v3891_v37 = vpop.f32.mrf.mxu0  ;;  %v807_v14 = vadd.f32 %v3865_v49, %v4819_v2 }
 0x126   : > { %v4968_v31 = vadd.f32 %v3891_v37, %v791_v26  ;;  %v798_v35 = vpop.f32.mrf.mxu1 }
 0x127   : > { %v1008_v24 = vpop.f32.mrf.mxu0  ;;  %v799_v20 = vadd.f32 %v798_v35, %v4829_v11 }
 0x128   : > { %v4971_v38 = vadd.f32 %v1008_v24, %v783_v33  ;;  %v3866_v57 = vpop.f32.mrf.mxu1 }
 0x129   : > { %v3892_v47 = vpop.f32.mrf.mxu0  ;;  %v810_v13 = vadd.f32 %v3866_v57, %v4837_v18 }
 0x12a   : > { %v4974_v12 = vadd.f32 %v3892_v47, %v794_v44  ;;  %v801_v3 = vpop.f32.mrf.mxu1 }
 0x12b   : > { %v1011_v42 = vpop.f32.mrf.mxu0  ;;  %v802_v29 = vadd.f32 %v801_v3, %v4845_v45 }
 0x12c   : > { %v4977_v53 = vadd.f32 %v1011_v42, %v786_v17  ;;  %v3901_v2 = vpop.f32.mrf.mxu1 }
 0x12d   : > { %v3895_v55 = vpop.f32.mrf.mxu0  ;;  %v1359_v51 = vadd.f32 %v3901_v2, %v4883_v9 }
 0x12e   : > { %v4980_v28 = vadd.f32 %v3895_v55, %v807_v14  ;;  %v1246_v11 = vpop.f32.mrf.mxu1 }
 0x12f   : > { %v1024_v34 = vpop.f32.mrf.mxu0  ;;  %v1357_v52 = vadd.f32 %v1246_v11, %v4890_v25 }
 0x130   : > { %v4983_v16 = vadd.f32 %v1024_v34, %v799_v20  ;;  %v3902_v18 = vpop.f32.mrf.mxu1 }
 0x131   : > { %v3896_v46 = vpop.f32.mrf.mxu0  ;;  %v1360_v0 = vadd.f32 %v3902_v18, %v4895_v32 }
 0x132   : > { %v4986_v60 = vadd.f32 %v3896_v46, %v810_v13  ;;  %v1249_v45 = vpop.f32.mrf.mxu1 }
 0x133   : > { %v1027_v50 = vpop.f32.mrf.mxu0  ;;  %v1358_v1 = vadd.f32 %v1249_v45, %v4901_v54 }
 0x134   : > { %v4989_v7 = vadd.f32 %v1027_v50, %v802_v29  ;;  %v3905_v9 = vpop.f32.mrf.mxu1 }
 0x135   : > { %v3931_v6 = vpop.f32.mrf.mxu0  ;;  %v1363_v26 = vadd.f32 %v3905_v9, %v4907_v39 }
 0x136   : > { %v4992_v43 = vadd.f32 %v3931_v6, %v1359_v51  ;;  %v1262_v25 = vpop.f32.mrf.mxu1 }
 0x137   : > { %v1684_v22 = vpop.f32.mrf.mxu0  ;;  %v1361_v33 = vadd.f32 %v1262_v25, %v4914_v61 }
 0x138   : > { %v4995_v56 = vadd.f32 %v1684_v22, %v1357_v52  ;;  %v3906_v32 = vpop.f32.mrf.mxu1 }
 0x139   : > { %v3932_v27 = vpop.f32.mrf.mxu0  ;;  %v1364_v44 = vadd.f32 %v3906_v32, %v4918_v8 }
 0x13a   : > { %v4998_v63 = vadd.f32 %v3932_v27, %v1360_v0  ;;  %v1265_v54 = vpop.f32.mrf.mxu1 }
 0x13b   : > { %v1687_v36 = vpop.f32.mrf.mxu0  ;;  %v1362_v17 = vadd.f32 %v1265_v54, %v4923_v23 }
 0x13c   : > { %v5001_v41 = vadd.f32 %v1687_v36, %v1358_v1  ;;  %v3909_v39 = vpop.f32.mrf.mxu1 }
 0x13d   : > { %v3935_v37 = vpop.f32.mrf.mxu0  ;;  %v1367_v14 = vadd.f32 %v3909_v39, %v4928_v30 }
 0x13e   : > { %v5004_v49 = vadd.f32 %v3935_v37, %v1363_v26  ;;  %v1278_v61 = vpop.f32.mrf.mxu1 }
 0x13f   : > { %v1700_v24 = vpop.f32.mrf.mxu0  ;;  %v1365_v20 = vadd.f32 %v1278_v61, %v4933_v62 }
 0x140   : > { %v5007_v35 = vadd.f32 %v1700_v24, %v1361_v33  ;;  %v3910_v8 = vpop.f32.mrf.mxu1 }
 0x141   : > { %v3936_v47 = vpop.f32.mrf.mxu0  ;;  %v1368_v13 = vadd.f32 %v3910_v8, %v4936_v48 }
 0x142   : > { %v5010_v57 = vadd.f32 %v3936_v47, %v1364_v44  ;;  %v1281_v23 = vpop.f32.mrf.mxu1 }
 0x143   : > { %v1703_v42 = vpop.f32.mrf.mxu0  ;;  %v1366_v29 = vadd.f32 %v1281_v23, %v4940_v5 }
 0x144   : > { %v5013_v3 = vadd.f32 %v1703_v42, %v1362_v17  ;;  %v3913_v30 = vpop.f32.mrf.mxu1 }
 0x145   : > { %v3939_v55 = vpop.f32.mrf.mxu0  ;;  %v1371_v51 = vadd.f32 %v3913_v30, %v4944_v15 }
 0x146   : > { %v5016_v2 = vadd.f32 %v3939_v55, %v1367_v14  ;;  %v1294_v62 = vpop.f32.mrf.mxu1 }
 0x147   : > { %v1716_v34 = vpop.f32.mrf.mxu0  ;;  %v1369_v52 = vadd.f32 %v1294_v62, %v4947_v19 }
 0x148   : > { %v5019_v11 = vadd.f32 %v1716_v34, %v1365_v20  ;;  %v3914_v48 = vpop.f32.mrf.mxu1 }
 0x149   : > { %v3940_v46 = vpop.f32.mrf.mxu0  ;;  %v1372_v0 = vadd.f32 %v3914_v48, %v4950_v59 }
 0x14a   : > { %v5022_v18 = vadd.f32 %v3940_v46, %v1368_v13  ;;  %v1297_v5 = vpop.f32.mrf.mxu1 }
 0x14b   : > { %v1719_v50 = vpop.f32.mrf.mxu0  ;;  %v1370_v1 = vadd.f32 %v1297_v5, %v4953_v58 }
 0x14c   : > { %v5025_v45 = vadd.f32 %v1719_v50, %v1366_v29  ;;  %v3917_v15 = vpop.f32.mrf.mxu1 }
 0x14d   : > { %v3943_v6 = vpop.f32.mrf.mxu0  ;;  %v1375_v26 = vadd.f32 %v3917_v15, %v4956_v4 }
 0x14e   : > { %v5028_v9 = vadd.f32 %v3943_v6, %v1371_v51  ;;  %v1310_v19 = vpop.f32.mrf.mxu1 }
 0x14f   : > { %v1732_v22 = vpop.f32.mrf.mxu0  ;;  %v1373_v33 = vadd.f32 %v1310_v19, %v4959_v21 }
 0x150   : > { %v5031_v25 = vadd.f32 %v1732_v22, %v1369_v52  ;;  %v3918_v59 = vpop.f32.mrf.mxu1 }
 0x151   : > { %v3944_v27 = vpop.f32.mrf.mxu0  ;;  %v1376_v44 = vadd.f32 %v3918_v59, %v4962_v40 }
 0x152   : > { %v5034_v32 = vadd.f32 %v3944_v27, %v1372_v0  ;;  %v1313_v58 = vpop.f32.mrf.mxu1 }
 0x153   : > { %v1735_v36 = vpop.f32.mrf.mxu0  ;;  %v1374_v17 = vadd.f32 %v1313_v58, %v4965_v10 }
 0x154   : > { %v5037_v54 = vadd.f32 %v1735_v36, %v1370_v1  ;;  %v3921_v4 = vpop.f32.mrf.mxu1 }
 0x155   : > { %v3947_v37 = vpop.f32.mrf.mxu0  ;;  %v1379_v14 = vadd.f32 %v3921_v4, %v4968_v31 }
 0x156   : > { %v5040_v39 = vadd.f32 %v3947_v37, %v1375_v26  ;;  %v1326_v21 = vpop.f32.mrf.mxu1 }
 0x157   : > { %v1748_v24 = vpop.f32.mrf.mxu0  ;;  %v1377_v20 = vadd.f32 %v1326_v21, %v4971_v38 }
 0x158   : > { %v5043_v61 = vadd.f32 %v1748_v24, %v1373_v33  ;;  %v3922_v40 = vpop.f32.mrf.mxu1 }
 0x159   : > { %v3948_v47 = vpop.f32.mrf.mxu0  ;;  %v1380_v13 = vadd.f32 %v3922_v40, %v4974_v12 }
 0x15a   : > { %v5046_v8 = vadd.f32 %v3948_v47, %v1376_v44  ;;  %v1329_v10 = vpop.f32.mrf.mxu1 }
 0x15b   : > { %v1751_v42 = vpop.f32.mrf.mxu0  ;;  %v1378_v29 = vadd.f32 %v1329_v10, %v4977_v53 }
 0x15c   : > { %5358 = vst [vmem:[#allocation2_spill] sm:$0xff] %v5046_v8  ;;  %v5049_v23 = vadd.f32 %v1751_v42, %v1374_v17  ;;  %v3925_v31 = vpop.f32.mrf.mxu1 }
 0x15d   : > { %v3951_v55 = vpop.f32.mrf.mxu0  ;;  %v1383_v51 = vadd.f32 %v3925_v31, %v4980_v28 }
 0x15e   : > { %5359 = vst [vmem:[#allocation3_spill] sm:$0xff] %v5049_v23  ;;  %v5052_v30 = vadd.f32 %v3951_v55, %v1379_v14  ;;  %v1342_v38 = vpop.f32.mrf.mxu1 }
 0x15f   : > { %v1764_v34 = vpop.f32.mrf.mxu0  ;;  %v1381_v52 = vadd.f32 %v1342_v38, %v4983_v16 }
 0x160   : > { %5360 = vst [vmem:[#allocation4_spill] sm:$0xff] %v5052_v30  ;;  %v5055_v62 = vadd.f32 %v1764_v34, %v1377_v20  ;;  %v3926_v12 = vpop.f32.mrf.mxu1 }
 0x161   : > { %v3952_v46 = vpop.f32.mrf.mxu0  ;;  %v1384_v0 = vadd.f32 %v3926_v12, %v4986_v60 }
 0x162   : > { %5361 = vst [vmem:[#allocation5_spill] sm:$0xff] %v5055_v62  ;;  %v5058_v48 = vadd.f32 %v3952_v46, %v1380_v13  ;;  %v1345_v53 = vpop.f32.mrf.mxu1 }
 0x163   : > { %v1767_v50 = vpop.f32.mrf.mxu0  ;;  %v1382_v1 = vadd.f32 %v1345_v53, %v4989_v7 }
 0x164   : > { %5362 = vst [vmem:[#allocation6_spill] sm:$0xff] %v5058_v48  ;;  %v5061_v5 = vadd.f32 %v1767_v50, %v1378_v29  ;;  %v3961_v28 = vpop.f32.mrf.mxu1 }
 0x165   : > { %v3955_v6 = vpop.f32.mrf.mxu0 }
 0x166   : > { %5363 = vst [vmem:[#allocation7_spill] sm:$0xff] %v5061_v5  ;;  %v5064_v15 = vadd.f32 %v3955_v6, %v1383_v51  ;;  %v1937_v19 = vpop.f32.mrf.mxu1 }
 0x167   : > { %v1780_v22 = vpop.f32.mrf.mxu0 }
 0x168   : > { %5364 = vst [vmem:[#allocation8_spill] sm:$0xff] %v5064_v15  ;;  %v5066_v26 = vadd.f32 %v1780_v22, %v1381_v52  ;;  %v3962_v33 = vpop.f32.mrf.mxu1 }
 0x169   : > { %v3956_v16 = vpop.f32.mrf.mxu0 }
 0x16a   : > { %5365 = vst [vmem:[#allocation9_spill] sm:$0xff] %v5066_v26  ;;  %v5068_v27 = vadd.f32 %v3956_v16, %v1384_v0  ;;  %v5072_v60 = vpop.f32.mrf.mxu1 }
 0x16b   : > { %v1783_v59 = vpop.f32.mrf.mxu0 }
 0x16c   : > { %5366 = vst [vmem:[#allocation10_spill] sm:$0xff] %v5068_v27  ;;  %v5070_v36 = vadd.f32 %v1783_v59, %v1382_v1  ;;  %v5074_v58 = vpop.f32.mrf.mxu1 }
 0x16d   : > { %v3991_v44 = vpop.f32.mrf.mxu0 }
 0x16e   : > { %5367 = vst [vmem:[#allocation11_spill] sm:$0xff] %v5070_v36  ;;  %v5076_v37 = vpop.f32.mrf.mxu1 }
 0x16f   : > { %v2255_v7 = vpop.f32.mrf.mxu0 }
 0x170   : > { %v5078_v4 = vpop.f32.mrf.mxu1 }
 0x171   : > { %v3992_v17 = vpop.f32.mrf.mxu0 }
 0x172   : > { %v5082_v14 = vpop.f32.mrf.mxu1 }
 0x173   : > { %v5080_v24 = vpop.f32.mrf.mxu0 }
 0x174   : > { %v5086_v47 = vpop.f32.mrf.mxu1 }
 0x175   : > { %v5084_v21 = vpop.f32.mrf.mxu0 }
 0x176   : > { %v5090_v40 = vpop.f32.mrf.mxu1 }
 0x177   : > { %v5088_v20 = vpop.f32.mrf.mxu0 }
 0x178   : > { %v5094_v13 = vpop.f32.mrf.mxu1 }
 0x179   : > { %v5092_v42 = vpop.f32.mrf.mxu0 }
 0x17a   : > { %v5098_v55 = vpop.f32.mrf.mxu1 }
 0x17b   : > { %v5096_v10 = vpop.f32.mrf.mxu0 }
 0x17c   : > { %v5102_v31 = vpop.f32.mrf.mxu1 }
 0x17d   : > { %v5100_v29 = vpop.f32.mrf.mxu0 }
 0x17e   : > { %v5106_v51 = vpop.f32.mrf.mxu1 }
 0x17f   : > { %v5104_v34 = vpop.f32.mrf.mxu0 }
 0x180   : > { %v5110_v46 = vpop.f32.mrf.mxu1 }
 0x181   : > { %v5108_v38 = vpop.f32.mrf.mxu0 }
 0x182   : > { %v5114_v12 = vpop.f32.mrf.mxu1 }
 0x183   : > { %v5112_v52 = vpop.f32.mrf.mxu0 }
 0x184   : > { %v5118_v0 = vpop.f32.mrf.mxu1 }
 0x185   : > { %v5116_v50 = vpop.f32.mrf.mxu0 }
 0x186   : > { %v5122_v6 = vpop.f32.mrf.mxu1 }
 0x187   : > { %v5120_v53 = vpop.f32.mrf.mxu0  ;;  %5368 = vst [vmem:[#allocation12_spill] sm:$0xff] %v5122_v6 }
 0x188   : > { %v5126_v22 = vpop.f32.mrf.mxu1 }
 0x189   : > { %v5124_v1 = vpop.f32.mrf.mxu0  ;;  %5369 = vst [vmem:[#allocation13_spill] sm:$0xff] %v5126_v22 }
 0x18a   : > { %v5130_v59 = vpop.f32.mrf.mxu1 }
 0x18b   : > { %v5128_v16 = vpop.f32.mrf.mxu0  ;;  %5371 = vst [vmem:[#allocation15_spill] sm:$0xff] %v5130_v59 }
 0x18c   : > { %5370 = vst [vmem:[#allocation14_spill] sm:$0xff] %v5128_v16  ;;  %v5134_v27 = vpop.f32.mrf.mxu1 }
 0x18d   : > { %v5132_v36 = vpop.f32.mrf.mxu0  ;;  %5373 = vst [vmem:[#allocation17_spill] sm:$0xff] %v5134_v27 }
 0x18e   : > { %5372 = vst [vmem:[#allocation16_spill] sm:$0xff] %v5132_v36  ;;  %v5138_v15 = vpop.f32.mrf.mxu1 }
 0x18f   : > { %v5136_v26 = vpop.f32.mrf.mxu0  ;;  %5375 = vst [vmem:[#allocation19_spill] sm:$0xff] %v5138_v15 }
 0x190   : > { %5374 = vst [vmem:[#allocation18_spill] sm:$0xff] %v5136_v26  ;;  %v5142_v48 = vpop.f32.mrf.mxu1 }
 0x191   : > { %v5140_v5 = vpop.f32.mrf.mxu0  ;;  %5377 = vst [vmem:[#allocation21_spill] sm:$0xff] %v5142_v48 }
 0x192   : > { %5376 = vst [vmem:[#allocation20_spill] sm:$0xff] %v5140_v5  ;;  %v5146_v30 = vpop.f32.mrf.mxu1 }
 0x193   : > { %v5144_v62 = vpop.f32.mrf.mxu0  ;;  %5379 = vst [vmem:[#allocation23_spill] sm:$0xff] %v5146_v30 }
 0x194   : > { %5378 = vst [vmem:[#allocation22_spill] sm:$0xff] %v5144_v62  ;;  %v5150_v22 = vpop.f32.mrf.mxu1 }
 0x195   : > { %v5148_v23 = vpop.f32.mrf.mxu0  ;;  %5381 = vst [vmem:[#allocation25_spill] sm:$0xff] %v5150_v22 }
 0x196   : > { %5380 = vst [vmem:[#allocation24_spill] sm:$0xff] %v5148_v23  ;;  %v5154_v8 = vpop.f32.mrf.mxu1  ;;  %v2050_v23 = vadd.f32 %v3961_v28, %v4992_v43  ;;  %v5178_v43 = vld [vmem:[%s5356_s2] ss:$0 sm:$0xff] }
 0x197   : > { %v5152_v59 = vpop.f32.mrf.mxu0  ;;  %5383 = vst [vmem:[#allocation27_spill] sm:$0xff] %v5154_v8  ;;  %v2048_v8 = vadd.f32 %v1937_v19, %v4995_v56  ;;  %v2049_v56 = vadd.f32 %v5072_v60, %v5001_v41 }
 0x198   : > { %5382 = vst [vmem:[#allocation26_spill] sm:$0xff] %v5152_v59  ;;  %v5158_v26 = vpop.f32.mrf.mxu1 }
 0x199   : > { %v5156_v27 = vpop.f32.mrf.mxu0  ;;  %5385 = vst [vmem:[#allocation29_spill] sm:$0xff] %v5158_v26 }
 0x19a   : > { %5384 = vst [vmem:[#allocation28_spill] sm:$0xff] %v5156_v27  ;;  %v5162_v5 = vpop.f32.mrf.mxu1  ;;  %v2368_v27 = vadd.f32 %v3991_v44, %v2050_v23 }
 0x19b   : > { %v5160_v15 = vpop.f32.mrf.mxu0  ;;  %5387 = vst [vmem:[#allocation31_spill] sm:$0xff] %v5162_v5  ;;  %v2366_v5 = vadd.f32 %v2255_v7, %v2048_v8 }
 0x19c   : > { %5386 = vst [vmem:[#allocation30_spill] sm:$0xff] %v5160_v15  ;;  %v4021_v62 = vpop.f32.mrf.mxu1  ;;  %v2051_v15 = vadd.f32 %v3962_v33, %v4998_v63  ;;  %v2054_v63 = vadd.f32 %v5074_v58, %v5004_v49  ;;  %v2052_v33 = vadd.f32 %v5076_v37, %v5007_v35  ;;  %v2055_v49 = vadd.f32 %v5078_v4, %v5010_v57 }
 0x19d   : > { %v5164_v48 = vpop.f32.mrf.mxu0  ;;  %v2806_v16 = vadd.f32 %v4021_v62, %v2368_v27 }
 0x19e   : > { %5388 = vst [vmem:[#allocation32_spill] sm:$0xff] %v5164_v48  ;;  %v2693_v22 = vpop.f32.mrf.mxu1  ;;  %v2369_v28 = vadd.f32 %v3992_v17, %v2051_v15  ;;  %v2367_v15 = vadd.f32 %v5080_v24, %v2049_v56  ;;  %v2372_v7 = vadd.f32 %v5084_v21, %v2054_v63  ;;  %v2370_v58 = vadd.f32 %v5088_v20, %v2052_v33 }
 0x19f   : > { %v5166_v30 = vpop.f32.mrf.mxu0  ;;  %v2373_v57 = vadd.f32 %v5092_v42, %v2055_v49  ;;  %v2053_v56 = vadd.f32 %v5082_v14, %v5013_v3 }
 0x1a0   : > { %5389 = vst [vmem:[#allocation33_spill] sm:$0xff] %v5166_v30  ;;  %v4022_v59 = vpop.f32.mrf.mxu1 }
 0x1a1   : > { %v5169_v36 = vpop.f32.mrf.mxu0  ;;  %v2807_v8 = vadd.f32 %v4022_v59, %v2369_v28  ;;  %v2371_v3 = vadd.f32 %v5096_v10, %v2053_v56  ;;  %v2060_v56 = vadd.f32 %v5106_v51, %v5031_v25 }
 0x1a2   : > { %5390 = vst [vmem:[#allocation34_spill] sm:$0xff] %v5169_v36  ;;  %v2696_v48 = vpop.f32.mrf.mxu1  ;;  %v2804_v36 = vadd.f32 %v2693_v22, %v2366_v5 }
 0x1a3   : > { %v5172_v26 = vpop.f32.mrf.mxu0  ;;  %v2378_v25 = vadd.f32 %v5120_v53, %v2060_v56 }
 0x1a4   : > { %v4025_v23 = vpop.f32.mrf.mxu1 }
 0x1a5   : > { %v4051_v6 = vpop.f32.mrf.mxu0  ;;  %v2810_v37 = vadd.f32 %v4025_v23, %v2372_v7  ;;  %v2058_v23 = vadd.f32 %v5086_v47, %v5016_v2 }
 0x1a6   : > { %v3059_v30 = vadd.f32 %v4051_v6, %v2806_v16  ;;  %v2709_v5 = vpop.f32.mrf.mxu1 }
 0x1a7   : > { %v2946_v19 = vpop.f32.mrf.mxu0  ;;  %v2808_v22 = vadd.f32 %v2709_v5, %v2370_v58  ;;  %v2376_v2 = vadd.f32 %v5100_v29, %v2058_v23 }
 0x1a8   : > { %v3094_v62 = vadd.f32 %v5178_v43, %v3059_v30  ;;  %v3057_v27 = vadd.f32 %v2946_v19, %v2804_v36  ;;  %v2805_v30 = vadd.f32 %v2696_v48, %v2367_v15  ;;  %v4026_v35 = vpop.f32.mrf.mxu1  ;;  %v2056_v15 = vadd.f32 %v5090_v40, %v5019_v11 }
 0x1a9   : > { %v4052_v44 = vpop.f32.mrf.mxu0 }
 0x1aa   : > { %v3122_v41 = vmax.f32 %v3094_v62, 0.0  ;;  %v3092_v60 = vadd.f32 %v5178_v43, %v3057_v27  ;;  %v3060_v17 = vadd.f32 %v4052_v44, %v2807_v8  ;;  %v2712_v4 = vpop.f32.mrf.mxu1  ;;  %v2811_v8 = vadd.f32 %v4026_v35, %v2373_v57 }
 0x1ab   : > { %v2949_v36 = vpop.f32.mrf.mxu0  ;;  %v2374_v11 = vadd.f32 %v5104_v34, %v2056_v15  ;;  %v2809_v40 = vadd.f32 %v2712_v4, %v2371_v3  ;;  %v2057_v57 = vadd.f32 %v5098_v55, %v5025_v45  ;;  %v2062_v4 = vadd.f32 %v5102_v31, %v5028_v9 }
 0x1ac   : > { %v3646_v24 = vpack.c.bf16 %v3122_v41, %v3122_v41  ;;  %v3120_v21 = vmax.f32 %v3092_v60, 0.0  ;;  %v3095_v6 = vadd.f32 %v5178_v43, %v3060_v17  ;;  %v3058_v20 = vadd.f32 %v2949_v36, %v2805_v30  ;;  %v4029_v63 = vpop.f32.mrf.mxu1 }
 0x1ad   : > { %v4055_v48 = vpop.f32.mrf.mxu0  ;;  %v2059_v60 = vadd.f32 %v5094_v13, %v5022_v18  ;;  %v2814_v58 = vadd.f32 %v4029_v63, %v2376_v2  ;;  %v2375_v45 = vadd.f32 %v5112_v52, %v2057_v57  ;;  %v2380_v9 = vadd.f32 %v5116_v50, %v2062_v4 }
 0x1ae   : > { %3263 = vst.msk [vmem:[%s5197_s19 + $0x8] sm:$0xf] %vm3260_vm4, %v3646_v24  ;;  %v3644_v16 = vpack.c.bf16 %v3120_v21, %v3120_v21  ;;  %v3123_v59 = vmax.f32 %v3095_v6, 0.0  ;;  %v3063_v28 = vadd.f32 %v4055_v48, %v2810_v37  ;;  %v3093_v19 = vadd.f32 %v5178_v43, %v3058_v20  ;;  %v2725_v5 = vpop.f32.mrf.mxu1 }
 0x1af   : > { %v2962_v42 = vpop.f32.mrf.mxu0  ;;  %v2377_v36 = vadd.f32 %v5108_v38, %v2059_v60  ;;  %v2812_v18 = vadd.f32 %v2725_v5, %v2374_v11 }
 0x1b0   : > { %3261 = vst.msk [vmem:[%s5197_s19] sm:$0xf] %vm3260_vm4, %v3644_v16  ;;  %v3647_v62 = vpack.c.bf16 %v3123_v59, %v3123_v59  ;;  %v3098_v27 = vadd.f32 %v5178_v43, %v3063_v28  ;;  %v3061_v33 = vadd.f32 %v2962_v42, %v2808_v22  ;;  %v3121_v14 = vmax.f32 %v3093_v19, 0.0  ;;  %v4030_v17 = vpop.f32.mrf.mxu1 }
 0x1b1   : > { %v4056_v44 = vpop.f32.mrf.mxu0  ;;  %v2815_v22 = vadd.f32 %v4030_v17, %v2377_v36 }
 0x1b2   : > { %3264 = vst.msk [vmem:[%s5197_s19 + $0xc] sm:$0xf] %vm3260_vm4, %v3647_v62  ;;  %v3126_v47 = vmax.f32 %v3098_v27, 0.0  ;;  %v3096_v7 = vadd.f32 %v5178_v43, %v3061_v33  ;;  %v3064_v41 = vadd.f32 %v4056_v44, %v2811_v8  ;;  %v3645_v10 = vpack.c.bf16 %v3121_v14, %v3121_v14  ;;  %v2728_v37 = vpop.f32.mrf.mxu1 }
 0x1b3   : > { %v2965_v49 = vpop.f32.mrf.mxu0  ;;  %v2063_v8 = vadd.f32 %v5110_v46, %v5034_v32  ;;  %v2813_v51 = vadd.f32 %v2728_v37, %v2375_v45 }
 0x1b4   : > { %v3650_v30 = vpack.c.bf16 %v3126_v47, %v3126_v47  ;;  %v3124_v29 = vmax.f32 %v3096_v7, 0.0  ;;  %v3099_v35 = vadd.f32 %v5178_v43, %v3064_v41  ;;  %3262 = vst.msk [vmem:[%s5197_s19 + $0x4] sm:$0xf] %vm3260_vm4, %v3645_v10  ;;  %v3062_v24 = vadd.f32 %v2965_v49, %v2809_v40  ;;  %v4033_v20 = vpop.f32.mrf.mxu1 }
 0x1b5   : > { %v4059_v21 = vpop.f32.mrf.mxu0  ;;  %v2818_v33 = vadd.f32 %v4033_v20, %v2380_v9  ;;  %v2381_v14 = vadd.f32 %v5124_v1, %v2063_v8  ;;  %v2061_v7 = vadd.f32 %v5114_v12, %v5037_v54  ;;  %v2066_v41 = vadd.f32 %v5118_v0, %v5040_v39  ;;  %v5393_v39 = vld [vmem:[#allocation16_spill] sm:$0xff]  ;;  %v5399_v8 = vld [vmem:[#allocation15_spill] sm:$0xff] }
 0x1b6   : > { %3267 = vst.msk [vmem:[%s5197_s19 + $0x18] sm:$0xf] %vm3260_vm4, %v3650_v30  ;;  %v3648_v13 = vpack.c.bf16 %v3124_v29, %v3124_v29  ;;  %v3127_v34 = vmax.f32 %v3099_v35, 0.0  ;;  %v3067_v6 = vadd.f32 %v4059_v21, %v2814_v58  ;;  %v3097_v38 = vadd.f32 %v5178_v43, %v3062_v24  ;;  %v2741_v23 = vpop.f32.mrf.mxu1  ;;  %v5391_v58 = vld [vmem:[#allocation12_spill] sm:$0xff]  ;;  %v5392_v29 = vld [vmem:[#allocation14_spill] sm:$0xff] }
 0x1b7   : > { %v2978_v48 = vpop.f32.mrf.mxu0  ;;  %v2816_v32 = vadd.f32 %v2741_v23, %v2378_v25  ;;  %v2064_v30 = vadd.f32 %v5391_v58, %v5043_v61  ;;  %v2379_v54 = vadd.f32 %v5392_v29, %v2061_v7  ;;  %v2384_v0 = vadd.f32 %v5393_v39, %v2066_v41 }
 0x1b8   : > { %3265 = vst.msk [vmem:[%s5197_s19 + $0x10] sm:$0xf] %vm3260_vm4, %v3648_v13  ;;  %v3651_v16 = vpack.c.bf16 %v3127_v34, %v3127_v34  ;;  %v3102_v59 = vadd.f32 %v5178_v43, %v3067_v6  ;;  %v3065_v28 = vadd.f32 %v2978_v48, %v2812_v18  ;;  %v3125_v55 = vmax.f32 %v3097_v38, 0.0  ;;  %v4034_v62 = vpop.f32.mrf.mxu1  ;;  %v5394_v18 = vld [vmem:[#allocation2_spill] sm:$0xff]  ;;  %v5395_v13 = vld [vmem:[#allocation13_spill] sm:$0xff] }
 0x1b9   : > { %v4060_v19 = vpop.f32.mrf.mxu0  ;;  %v2819_v40 = vadd.f32 %v4034_v62, %v2381_v14  ;;  %v2067_v34 = vadd.f32 %v5395_v13, %v5394_v18  ;;  %v5396_v6 = vld [vmem:[#allocation18_spill] sm:$0xff] }
 0x1ba   : > { %3268 = vst.msk [vmem:[%s5197_s19 + $0x1c] sm:$0xf] %vm3260_vm4, %v3651_v16  ;;  %v3130_v31 = vmax.f32 %v3102_v59, 0.0  ;;  %v3100_v63 = vadd.f32 %v5178_v43, %v3065_v28  ;;  %v3068_v42 = vadd.f32 %v4060_v19, %v2815_v22  ;;  %v3649_v52 = vpack.c.bf16 %v3125_v55, %v3125_v55  ;;  %v2744_v5 = vpop.f32.mrf.mxu1  ;;  %v5397_v28 = vld [vmem:[#allocation20_spill] sm:$0xff] }
 0x1bb   : > { %v2981_v27 = vpop.f32.mrf.mxu0  ;;  %v2382_v61 = vadd.f32 %v5396_v6, %v2064_v30  ;;  %v2817_v57 = vadd.f32 %v2744_v5, %v2379_v54  ;;  %v2385_v56 = vadd.f32 %v5397_v28, %v2067_v34  ;;  %v5408_v30 = vld [vmem:[#allocation26_spill] sm:$0xff] }
 0x1bc   : > { %v3654_v15 = vpack.c.bf16 %v3130_v31, %v3130_v31  ;;  %v3128_v50 = vmax.f32 %v3100_v63, 0.0  ;;  %v3103_v3 = vadd.f32 %v5178_v43, %v3068_v42  ;;  %3266 = vst.msk [vmem:[%s5197_s19 + $0x14] sm:$0xf] %vm3260_vm4, %v3649_v52  ;;  %v3066_v44 = vadd.f32 %v2981_v27, %v2813_v51  ;;  %v4037_v60 = vpop.f32.mrf.mxu1  ;;  %v5398_v42 = vld [vmem:[#allocation3_spill] sm:$0xff]  ;;  %v5400_v51 = vld [vmem:[#allocation4_spill] sm:$0xff]  ;;  %v5401_v52 = vld [vmem:[#allocation17_spill] sm:$0xff] }
 0x1bd   : > { %v4063_v2 = vpop.f32.mrf.mxu0  ;;  %v2822_v48 = vadd.f32 %v4037_v60, %v2384_v0  ;;  %v2065_v25 = vadd.f32 %v5399_v8, %v5398_v42  ;;  %v2070_v62 = vadd.f32 %v5401_v52, %v5400_v51  ;;  %v5415_v42 = vld [vmem:[#allocation27_spill] sm:$0xff] }
 0x1be   : > { %3271 = vst.msk [vmem:[%s5197_s19 + $0x28] sm:$0xf] %vm3260_vm4, %v3654_v15  ;;  %v3652_v46 = vpack.c.bf16 %v3128_v50, %v3128_v50  ;;  %v3131_v53 = vmax.f32 %v3103_v3, 0.0  ;;  %v3071_v47 = vadd.f32 %v4063_v2, %v2818_v33  ;;  %v3101_v1 = vadd.f32 %v5178_v43, %v3066_v44  ;;  %v2757_v35 = vpop.f32.mrf.mxu1  ;;  %v5402_v44 = vld [vmem:[#allocation5_spill] sm:$0xff]  ;;  %v5403_v2 = vld [vmem:[#allocation19_spill] sm:$0xff] }
 0x1bf   : > { %v2994_v11 = vpop.f32.mrf.mxu0  ;;  %v2820_v19 = vadd.f32 %v2757_v35, %v2382_v61 }
 0x1c0   : > { %3269 = vst.msk [vmem:[%s5197_s19 + $0x20] sm:$0xf] %vm3260_vm4, %v3652_v46  ;;  %v3655_v10 = vpack.c.bf16 %v3131_v53, %v3131_v53  ;;  %v3106_v17 = vadd.f32 %v5178_v43, %v3071_v47  ;;  %v3069_v49 = vadd.f32 %v2994_v11, %v2816_v32  ;;  %v3129_v12 = vmax.f32 %v3101_v1, 0.0  ;;  %v4038_v38 = vpop.f32.mrf.mxu1  ;;  %v5404_v46 = vld [vmem:[#allocation22_spill] sm:$0xff]  ;;  %v5405_v1 = vld [vmem:[#allocation24_spill] sm:$0xff] }
 0x1c1   : > { %v4064_v36 = vpop.f32.mrf.mxu0  ;;  %v2823_v50 = vadd.f32 %v4038_v38, %v2385_v56  ;;  %v2068_v32 = vadd.f32 %v5403_v2, %v5402_v44  ;;  %v2383_v53 = vadd.f32 %v5404_v46, %v2065_v25  ;;  %v2388_v60 = vadd.f32 %v5405_v1, %v2070_v62  ;;  %v5416_v25 = vld [vmem:[#allocation30_spill] sm:$0xff]  ;;  %v5419_v44 = vld [vmem:[#allocation29_spill] sm:$0xff] }
 0x1c2   : > { %3272 = vst.msk [vmem:[%s5197_s19 + $0x2c] sm:$0xf] %vm3260_vm4, %v3655_v10  ;;  %v3134_v37 = vmax.f32 %v3106_v17, 0.0  ;;  %v3104_v24 = vadd.f32 %v5178_v43, %v3069_v49  ;;  %v3072_v21 = vadd.f32 %v4064_v36, %v2819_v40  ;;  %v3653_v4 = vpack.c.bf16 %v3129_v12, %v3129_v12  ;;  %v2760_v45 = vpop.f32.mrf.mxu1  ;;  %v5406_v17 = vld [vmem:[#allocation6_spill] sm:$0xff]  ;;  %v5407_v49 = vld [vmem:[#allocation21_spill] sm:$0xff] }
 0x1c3   : > { %v2997_v20 = vpop.f32.mrf.mxu0  ;;  %v2071_v58 = vadd.f32 %v5407_v49, %v5406_v17  ;;  %v2386_v29 = vadd.f32 %v5408_v30, %v2068_v32  ;;  %v2821_v54 = vadd.f32 %v2760_v45, %v2383_v53  ;;  %v5420_v32 = vld [vmem:[#allocation33_spill] sm:$0xff]  ;;  %v5422_v17 = vld [vmem:[#allocation31_spill] sm:$0xff] }
 0x1c4   : > { %v3658_v22 = vpack.c.bf16 %v3134_v37, %v3134_v37  ;;  %v3132_v16 = vmax.f32 %v3104_v24, 0.0  ;;  %v3107_v59 = vadd.f32 %v5178_v43, %v3072_v21  ;;  %3270 = vst.msk [vmem:[%s5197_s19 + $0x24] sm:$0xf] %vm3260_vm4, %v3653_v4  ;;  %v3070_v55 = vadd.f32 %v2997_v20, %v2817_v57  ;;  %v4041_v33 = vpop.f32.mrf.mxu1  ;;  %v5409_v21 = vld [vmem:[#allocation28_spill] sm:$0xff]  ;;  %v5410_v20 = vld [vmem:[#allocation7_spill] sm:$0xff] }
 0x1c5   : > { %v4067_v23 = vpop.f32.mrf.mxu0  ;;  %v2826_v39 = vadd.f32 %v4041_v33, %v2388_v60  ;;  %v2389_v18 = vadd.f32 %v5409_v21, %v2071_v58  ;;  %v5417_v33 = vld [vmem:[#allocation32_spill] sm:$0xff]  ;;  %v5423_v58 = vld [vmem:[#allocation34_spill] sm:$0xff] }
 0x1c6   : > { %3275 = vst.msk [vmem:[%s5197_s19 + $0x38] sm:$0xf] %vm3260_vm4, %v3658_v22  ;;  %v3656_v9 = vpack.c.bf16 %v3132_v16, %v3132_v16  ;;  %v3135_v31 = vmax.f32 %v3107_v59, 0.0  ;;  %v3075_v63 = vadd.f32 %v4067_v23, %v2822_v48  ;;  %v3105_v27 = vadd.f32 %v5178_v43, %v3070_v55  ;;  %v2773_v7 = vpop.f32.mrf.mxu1  ;;  %v5411_v48 = vld [vmem:[#allocation23_spill] sm:$0xff]  ;;  %v5412_v16 = vld [vmem:[#allocation8_spill] sm:$0xff]  ;;  %v5413_v59 = vld [vmem:[#allocation25_spill] sm:$0xff] }
 0x1c7   : > { %v3010_v15 = vpop.f32.mrf.mxu0  ;;  %v2824_v61 = vadd.f32 %v2773_v7, %v2386_v29  ;;  %v2069_v22 = vadd.f32 %v5411_v48, %v5410_v20  ;;  %v2074_v28 = vadd.f32 %v5413_v59, %v5412_v16 }
 0x1c8   : > { %3273 = vst.msk [vmem:[%s5197_s19 + $0x30] sm:$0xf] %vm3260_vm4, %v3656_v9  ;;  %v3659_v3 = vpack.c.bf16 %v3135_v31, %v3135_v31  ;;  %v3110_v14 = vadd.f32 %v5178_v43, %v3075_v63  ;;  %v3073_v5 = vadd.f32 %v3010_v15, %v2820_v19  ;;  %v3133_v47 = vmax.f32 %v3105_v27, 0.0  ;;  %v4042_v35 = vpop.f32.mrf.mxu1  ;;  %v5414_v63 = vld [vmem:[#allocation9_spill] sm:$0xff] }
 0x1c9   : > { %v4068_v41 = vpop.f32.mrf.mxu0  ;;  %v2827_v23 = vadd.f32 %v4042_v35, %v2389_v18  ;;  %v2072_v8 = vadd.f32 %v5415_v42, %v5414_v63  ;;  %v2387_v51 = vadd.f32 %v5416_v25, %v2069_v22  ;;  %v2392_v15 = vadd.f32 %v5417_v33, %v2074_v28 }
 0x1ca   : > { %3276 = vst.msk [vmem:[%s5197_s19 + $0x3c] sm:$0xf] %vm3260_vm4, %v3659_v3  ;;  %v3138_v11 = vmax.f32 %v3110_v14, 0.0  ;;  %v3108_v40 = vadd.f32 %v5178_v43, %v3073_v5  ;;  %v3076_v10 = vadd.f32 %v4068_v41, %v2823_v50  ;;  %v3657_v12 = vpack.c.bf16 %v3133_v47, %v3133_v47  ;;  %v2776_v13 = vpop.f32.mrf.mxu1  ;;  %v5418_v5 = vld [vmem:[#allocation10_spill] sm:$0xff] }
 0x1cb   : > { %v3013_v36 = vpop.f32.mrf.mxu0  ;;  %v2075_v2 = vadd.f32 %v5419_v44, %v5418_v5  ;;  %v2390_v46 = vadd.f32 %v5420_v32, %v2072_v8  ;;  %v2825_v53 = vadd.f32 %v2776_v13, %v2387_v51 }
 0x1cc   : > { %v3662_v0 = vpack.c.bf16 %v3138_v11, %v3138_v11  ;;  %v3136_v37 = vmax.f32 %v3108_v40, 0.0  ;;  %v3111_v24 = vadd.f32 %v5178_v43, %v3076_v10  ;;  %3274 = vst.msk [vmem:[%s5197_s19 + $0x34] sm:$0xf] %vm3260_vm4, %v3657_v12  ;;  %v3074_v34 = vadd.f32 %v3013_v36, %v2821_v54  ;;  %v4045_v45 = vpop.f32.mrf.mxu1  ;;  %v5421_v10 = vld [vmem:[#allocation11_spill] sm:$0xff] }
 0x1cd   : > { %v4071_v6 = vpop.f32.mrf.mxu0  ;;  %v2830_v1 = vadd.f32 %v4045_v45, %v2392_v15  ;;  %v2073_v49 = vadd.f32 %v5422_v17, %v5421_v10  ;;  %v2393_v30 = vadd.f32 %v5423_v58, %v2075_v2 }
 0x1ce   : > { %3279 = vst.msk [vmem:[%s5197_s19 + $0x48] sm:$0xf] %vm3260_vm4, %v3662_v0  ;;  %v3660_v57 = vpack.c.bf16 %v3136_v37, %v3136_v37  ;;  %v3139_v4 = vmax.f32 %v3111_v24, 0.0  ;;  %v3079_v38 = vadd.f32 %v4071_v6, %v2826_v39  ;;  %v3109_v56 = vadd.f32 %v5178_v43, %v3074_v34  ;;  %v2789_v62 = vpop.f32.mrf.mxu1 }
 0x1cf   : > { %v3026_v55 = vpop.f32.mrf.mxu0  ;;  %v2828_v12 = vadd.f32 %v2789_v62, %v2390_v46  ;;  %v2391_v0 = vadd.f32 %v5172_v26, %v2073_v49 }
 0x1d0   : > { %3277 = vst.msk [vmem:[%s5197_s19 + $0x40] sm:$0xf] %vm3260_vm4, %v3660_v57  ;;  %v3663_v19 = vpack.c.bf16 %v3139_v4, %v3139_v4  ;;  %v3114_v9 = vadd.f32 %v5178_v43, %v3079_v38  ;;  %v3077_v31 = vadd.f32 %v3026_v55, %v2824_v61  ;;  %v3137_v52 = vmax.f32 %v3109_v56, 0.0  ;;  %v4046_v7 = vpop.f32.mrf.mxu1 }
 0x1d1   : > { %v4072_v27 = vpop.f32.mrf.mxu0  ;;  %v2831_v18 = vadd.f32 %v4046_v7, %v2393_v30 }
 0x1d2   : > { %3280 = vst.msk [vmem:[%s5197_s19 + $0x4c] sm:$0xf] %vm3260_vm4, %v3663_v19  ;;  %v3142_v50 = vmax.f32 %v3114_v9, 0.0  ;;  %v3112_v3 = vadd.f32 %v5178_v43, %v3077_v31  ;;  %v3080_v14 = vadd.f32 %v4072_v27, %v2827_v23  ;;  %v3661_v47 = vpack.c.bf16 %v3137_v52, %v3137_v52  ;;  %v2792_v37 = vpop.f32.mrf.mxu1 }
 0x1d3   : > { %v3029_v41 = vpop.f32.mrf.mxu0  ;;  %v2829_v4 = vadd.f32 %v2792_v37, %v2391_v0 }
 0x1d4   : > { %v3666_v60 = vpack.c.bf16 %v3142_v50, %v3142_v50  ;;  %v3140_v11 = vmax.f32 %v3112_v3, 0.0  ;;  %v3115_v40 = vadd.f32 %v5178_v43, %v3080_v14  ;;  %3278 = vst.msk [vmem:[%s5197_s19 + $0x44] sm:$0xf] %vm3260_vm4, %v3661_v47  ;;  %v3078_v29 = vadd.f32 %v3029_v41, %v2825_v53 }
 0x1d5   : > { %v4075_v54 = vpop.f32.mrf.mxu0 }
 0x1d6   : > { %3283 = vst.msk [vmem:[%s5197_s19 + $0x58] sm:$0xf] %vm3260_vm4, %v3666_v60  ;;  %v3664_v35 = vpack.c.bf16 %v3140_v11, %v3140_v11  ;;  %v3143_v36 = vmax.f32 %v3115_v40, 0.0  ;;  %v3083_v39 = vadd.f32 %v4075_v54, %v2830_v1  ;;  %v3113_v24 = vadd.f32 %v5178_v43, %v3078_v29 }
 0x1d7   : > { %v3042_v21 = vpop.f32.mrf.mxu0 }
 0x1d8   : > { %3281 = vst.msk [vmem:[%s5197_s19 + $0x50] sm:$0xf] %vm3260_vm4, %v3664_v35  ;;  %v3667_v13 = vpack.c.bf16 %v3143_v36, %v3143_v36  ;;  %v3118_v34 = vadd.f32 %v5178_v43, %v3083_v39  ;;  %v3081_v6 = vadd.f32 %v3042_v21, %v2828_v12  ;;  %v3141_v61 = vmax.f32 %v3113_v24, 0.0 }
 0x1d9   : > { %v4076_v57 = vpop.f32.mrf.mxu0 }
 0x1da   : > { %3284 = vst.msk [vmem:[%s5197_s19 + $0x5c] sm:$0xf] %vm3260_vm4, %v3667_v13  ;;  %v3146_v26 = vmax.f32 %v3118_v34, 0.0  ;;  %v3116_v38 = vadd.f32 %v5178_v43, %v3081_v6  ;;  %v3084_v20 = vadd.f32 %v4076_v57, %v2831_v18  ;;  %v3665_v48 = vpack.c.bf16 %v3141_v61, %v3141_v61 }
 0x1db   : > { %v3045_v22 = vpop.f32.mrf.mxu0 }
 0x1dc   : > { %v3670_v16 = vpack.c.bf16 %v3146_v26, %v3146_v26  ;;  %v3144_v59 = vmax.f32 %v3116_v38, 0.0  ;;  %v3119_v28 = vadd.f32 %v5178_v43, %v3084_v20  ;;  %v3082_v56 = vadd.f32 %v3045_v22, %v2829_v4  ;;  %3282 = vst.msk [vmem:[%s5197_s19 + $0x54] sm:$0xf] %vm3260_vm4, %v3665_v48 }
 0x1de   : > { %3287 = vst.msk [vmem:[%s5197_s19 + $0x68] sm:$0xf] %vm3260_vm4, %v3670_v16  ;;  %v3668_v45 = vpack.c.bf16 %v3144_v59, %v3144_v59  ;;  %v3147_v55 = vmax.f32 %v3119_v28, 0.0  ;;  %v3117_v23 = vadd.f32 %v5178_v43, %v3082_v56 }
 0x1e0   : > { %3285 = vst.msk [vmem:[%s5197_s19 + $0x60] sm:$0xf] %vm3260_vm4, %v3668_v45  ;;  %v3671_v19 = vpack.c.bf16 %v3147_v55, %v3147_v55  ;;  %v3145_v9 = vmax.f32 %v3117_v23, 0.0 }
 0x1e2   : > { %3288 = vst.msk [vmem:[%s5197_s19 + $0x6c] sm:$0xf] %vm3260_vm4, %v3671_v19  ;;  %v3669_v31 = vpack.c.bf16 %v3145_v9, %v3145_v9 }
 0x1e4   : > { %3286 = vst.msk [vmem:[%s5197_s19 + $0x64] sm:$0xf] %vm3260_vm4, %v3669_v31 }
 0x1e5 PF: > { %s13_s14 = sadd.s32 1, %s4213_s14   ;;  %s5424_s12 = smov %s4209_s13 }
 0x1e6   : > { %p10_p5 = scmp.ge.s32.totalorder %s13_s14, 4   ;;  %s5425_s13 = smov %s5427_s15 }
 0x1e8   :  { %12 = sbr.rel (!%p10_p5) target bundleno = 2 (0x2), region = 76 }

</bundles_post_ra>
